<compile_context>
chip_gen: v7x
topology: tpu7x:2x2x1
jax: 0.10.0
libtpu: 0.0.40
codegen_flags: <defaults>
</compile_context>

<pallas_src>
import functools

import numpy as np
import jax
import jax.numpy as jnp
from jax import lax
from jax.experimental import pallas as pl
from jax.experimental.pallas import tpu as pltpu

# ----- stftm_loss constants (scaled down for the synthetic test) -------------
FRAME_SIZE = 256               # original repo uses 512
FRAME_SHIFT = 128              # original repo uses 256 (== frame_size // 2)
N_BINS = FRAME_SIZE // 2 + 1   # 129 real bins (DC .. Nyquist)
EPS = 1e-8


def _make_packed_dft_basis(frame_size):
    """Hann-windowed real-DFT basis packed into a single zero-free matrix.

    Columns 0..F/2        : cos for bins 0..F/2 (incl. DC and Nyquist)
    Columns F/2+k, k=1..F/2-1 : -sin for bins 1..F/2-1 (the bins with Im != 0)
    Total = (F/2+1) + (F/2-1) = F columns -> no zero padding.
    """
    n = np.arange(frame_size)[:, None].astype(np.float64)
    win = np.hanning(frame_size)[:, None]
    k_cos = np.arange(frame_size // 2 + 1)[None, :].astype(np.float64)
    k_sin = np.arange(1, frame_size // 2)[None, :].astype(np.float64)
    cos_b = win * np.cos(2.0 * np.pi * n * k_cos / frame_size)    # (F, F/2+1)
    sin_b = -win * np.sin(2.0 * np.pi * n * k_sin / frame_size)   # (F, F/2-1)
    basis = np.concatenate([cos_b, sin_b], axis=1).astype(np.float32)
    assert basis.shape == (frame_size, frame_size)
    return jnp.asarray(basis)


def _regularized_loss_kernel(g1_ref, fg1_ref, g2_ref, g1fx_ref, g2fx_ref,
                             basis_ref, out_ref, *, batch, t_len, n_chunks,
                             gamma):
    # Chunked layout: (batch * n_chunks, 128); batch b owns rows
    # [b*n_chunks, (b+1)*n_chunks), row j of that block = samples [j*128,(j+1)*128).
    g1 = g1_ref[...]      # x       (noisy input)
    fg1 = fg1_ref[...]    # y_pred
    g2 = g2_ref[...]      # y_true
    G1 = g1fx_ref[...]    # g1fx
    G2 = g2fx_ref[...]    # g2fx
    basis = basis_ref[...]            # (FRAME_SIZE, FRAME_SIZE) packed cos|sin

    n_frames = n_chunks - 1           # (T - FRAME_SIZE)//FRAME_SHIFT + 1
    inv_numel = 1.0 / float(batch * t_len)   # all-ones mask -> mask_sum == B*T

    # ---------------- time loss (masked MSE, mask == 1) & regularizer --------
    d = fg1 - g2                                  # reused by the regularizer
    loss_time = jnp.sum(d * d) * inv_numel
    r = d - (G1 - G2)                             # fg1 - g2 - G1 + G2
    reg = jnp.sum(r * r) * inv_numel

    # ---------------- lane masks for packed-bin recombination ----------------
    lane = lax.broadcasted_iota(jnp.int32, (n_frames, FRAME_SIZE), 1)
    mid_mask = (lane >= 1) & (lane <= N_BINS - 2)      # bins 1..127: cos + sin
    edge_mask = (lane == 0) | (lane == N_BINS - 1)     # bins 0 and 128: cos only

    freq_acc = jnp.float32(0.0)
    wsdr_acc = jnp.float32(0.0)
    for b in range(batch):            # static unroll over the (small) batch
        lo = b * n_chunks
        x = g1[lo:lo + n_chunks]      # (n_chunks, 128), sublane-aligned slices
        yp = fg1[lo:lo + n_chunks]
        yt = g2[lo:lo + n_chunks]

        # ---- freq loss: every frame of this signal in ONE MXU matmul --------
        # frame f = [chunk f | chunk f+1]; both views are 128-lane aligned.
        fo = jnp.concatenate([yp[0:n_frames], yp[1:n_chunks]], axis=1)  # (NF,256)
        fl = jnp.concatenate([yt[0:n_frames], yt[1:n_chunks]], axis=1)
        Mo = jnp.dot(fo, basis, preferred_element_type=jnp.float32)     # (NF,256)
        Ml = jnp.dot(fl, basis, preferred_element_type=jnp.float32)
        E = jnp.abs(Mo) - jnp.abs(Ml)            # per-component |.| difference
        # bin k (1..127): (|Re|+|Im|) diff = E[:,k] + E[:,128+k]  -> half-roll
        S = E + pltpu.roll(E, FRAME_SIZE // 2, 1)
        freq_acc = freq_acc + (
            jnp.sum(jnp.where(mid_mask, jnp.abs(S), 0.0))
            + jnp.sum(jnp.where(edge_mask, jnp.abs(E), 0.0)))

        # ---- wSDR (6 distinct reductions, each computed once) ---------------
        zt = x - yt
        zp = x - yp
        yt2 = jnp.sum(yt * yt)
        yp2 = jnp.sum(yp * yp)
        zt2 = jnp.sum(zt * zt)
        zp2 = jnp.sum(zp * zp)
        typ = jnp.sum(yt * yp)
        tzp = jnp.sum(zt * zp)
        sdr_t = -typ / (jnp.sqrt(yt2 * yp2) + EPS)
        sdr_z = -tzp / (jnp.sqrt(zt2 * zp2) + EPS)
        a = yt2 / (yt2 + zt2 + EPS)
        wsdr_acc = wsdr_acc + a * sdr_t + (1.0 - a) * sdr_z

    loss_freq = freq_acc * inv_numel
    loss1 = (0.8 * loss_time + 0.2 * loss_freq) / 600.0
    wsdr = wsdr_acc / float(batch)

    out_ref[0, 0] = loss1 + wsdr + gamma * reg


def regularized_loss(g1_wav, fg1_wav, g2_wav, g1fx, g2fx, gamma=1.0):
    B, C, T = g2_wav.shape
    assert C == 1
    assert T % FRAME_SHIFT == 0 and T >= FRAME_SIZE
    NC = T // FRAME_SHIFT          # number of 128-sample chunks per batch row

    # forward(): nframes is always the full time length -> all-ones mask, so the
    # mask input is dropped and mask_sum == B*T is folded into the kernel.
    # (The original compLossMask only handled B in {1, 2}; here every row is
    # treated as full length, which matches that forward path for any B.)

    def chunk(v):
        # (B, 1, T) row-major  ->  (B*NC, 128): a layout-identity reshape that
        # packs every vreg full (8 sublanes) inside the kernel.
        return v.astype(jnp.float32).reshape(B * NC, FRAME_SHIFT)

    g1c, fg1c, g2c, G1c, G2c = map(chunk, (g1_wav, fg1_wav, g2_wav, g1fx, g2fx))
    basis = _make_packed_dft_basis(FRAME_SIZE)

    kernel = functools.partial(_regularized_loss_kernel,
                               batch=B, t_len=T, n_chunks=NC, gamma=gamma)

    out = pl.pallas_call(
        kernel,
        out_shape=jax.ShapeDtypeStruct((1, 1), jnp.float32),
        in_specs=[pl.BlockSpec(memory_space=pltpu.MemorySpace.VMEM)] * 6,
        out_specs=pl.BlockSpec(memory_space=pltpu.MemorySpace.SMEM),
        compiler_params=pltpu.CompilerParams(vmem_limit_bytes=32 * 1024 * 1024),
    )(g1c, fg1c, g2c, G1c, G2c, basis)
    return out[0, 0]


# ----------------------------- pure-JAX reference ----------------------------
def _make_ref_dft_bases(frame_size):
    n = np.arange(frame_size)[:, None].astype(np.float64)
    k = np.arange(frame_size // 2 + 1)[None, :].astype(np.float64)
    ang = 2.0 * np.pi * n * k / frame_size
    win = np.hanning(frame_size)[:, None]
    return (jnp.asarray((win * np.cos(ang)).astype(np.float32)),
            jnp.asarray((-win * np.sin(ang)).astype(np.float32)))


def _reference_loss(g1, fg1, g2, G1, G2, gamma=1.0):
    B, _, T = g2.shape
    g1, fg1, g2, G1, G2 = (v.reshape(B, T).astype(jnp.float32)
                           for v in (g1, fg1, g2, G1, G2))
    mask = jnp.ones((B, T), jnp.float32)     # forward(): nframes == T
    mask_sum = jnp.sum(mask)

    mo, ml = fg1 * mask, g2 * mask
    loss_time = jnp.sum((mo - ml) ** 2) / mask_sum

    cos_b, sin_b = _make_ref_dft_bases(FRAME_SIZE)
    n_frames = (T - FRAME_SIZE) // FRAME_SHIFT + 1
    acc = 0.0
    for f in range(n_frames):
        lo = f * FRAME_SHIFT
        fo, fl = mo[:, lo:lo + FRAME_SIZE], ml[:, lo:lo + FRAME_SIZE]
        so = jnp.abs(fo @ cos_b) + jnp.abs(fo @ sin_b)
        sl = jnp.abs(fl @ cos_b) + jnp.abs(fl @ sin_b)
        acc = acc + jnp.sum(jnp.abs(so - sl))
    loss_freq = acc / mask_sum
    loss1 = (0.8 * loss_time + 0.2 * loss_freq) / 600.0

    def sdr(t, p):
        num = jnp.sum(t * p, axis=1)
        den = jnp.linalg.norm(t, axis=1) * jnp.linalg.norm(p, axis=1)
        return -(num / (den + EPS))

    zt, zp = g1 - g2, g1 - fg1
    a = jnp.sum(g2 ** 2, 1) / (jnp.sum(g2 ** 2, 1) + jnp.sum(zt ** 2, 1) + EPS)
    wsdr = jnp.mean(a * sdr(g2, fg1) + (1 - a) * sdr(zt, zp))
    reg = jnp.mean((fg1 - g2 - G1 + G2) ** 2)
    return loss1 + wsdr + gamma * reg


if __name__ == "__main__":
    B, C, T = 2, 1, 1024
    key = jax.random.PRNGKey(0)
    k1, k2, k3, k4, k5 = jax.random.split(key, 5)
    g1_wav = jax.random.normal(k1, (B, C, T), jnp.float32)
    fg1_wav = jax.random.normal(k2, (B, C, T), jnp.float32)
    g2_wav = jax.random.normal(k3, (B, C, T), jnp.float32)
    g1fx = jax.random.normal(k4, (B, C, T), jnp.float32)
    g2fx = jax.random.normal(k5, (B, C, T), jnp.float32)

    loss = regularized_loss(g1_wav, fg1_wav, g2_wav, g1fx, g2fx)
    loss = jax.block_until_ready(loss)

    ref = jax.block_until_ready(
        _reference_loss(g1_wav, fg1_wav, g2_wav, g1fx, g2fx))
    np.testing.assert_allclose(np.asarray(loss), np.asarray(ref),
                               rtol=2e-3, atol=2e-4)

    print("KERNEL_OK")
</pallas_src>

<mosaic_0001>
module attributes {stable_mosaic.version = 11 : i64} {
  func.func @_regularized_loss_kernel(%arg0: memref<16x128xf32, #tpu.memory_space<vmem>>, %arg1: memref<16x128xf32, #tpu.memory_space<vmem>>, %arg2: memref<16x128xf32, #tpu.memory_space<vmem>>, %arg3: memref<16x128xf32, #tpu.memory_space<vmem>>, %arg4: memref<16x128xf32, #tpu.memory_space<vmem>>, %arg5: memref<256x256xf32, #tpu.memory_space<vmem>>, %arg6: memref<1x1xf32, #tpu.memory_space<smem>>) attributes {dimension_semantics = [], scalar_prefetch = 0 : i64, scratch_operands = 0 : i64, tpu.core_type = #tpu.core_type<tc>} {
    %c0 = arith.constant 0 : index
    %c0_0 = arith.constant 0 : index
    %0 = vector.load %arg0[%c0, %c0_0] : memref<16x128xf32, #tpu.memory_space<vmem>>, vector<16x128xf32>
    %c0_1 = arith.constant 0 : index
    %c0_2 = arith.constant 0 : index
    %1 = vector.load %arg1[%c0_1, %c0_2] : memref<16x128xf32, #tpu.memory_space<vmem>>, vector<16x128xf32>
    %c0_3 = arith.constant 0 : index
    %c0_4 = arith.constant 0 : index
    %2 = vector.load %arg2[%c0_3, %c0_4] : memref<16x128xf32, #tpu.memory_space<vmem>>, vector<16x128xf32>
    %c0_5 = arith.constant 0 : index
    %c0_6 = arith.constant 0 : index
    %3 = vector.load %arg3[%c0_5, %c0_6] : memref<16x128xf32, #tpu.memory_space<vmem>>, vector<16x128xf32>
    %c0_7 = arith.constant 0 : index
    %c0_8 = arith.constant 0 : index
    %4 = vector.load %arg4[%c0_7, %c0_8] : memref<16x128xf32, #tpu.memory_space<vmem>>, vector<16x128xf32>
    %c0_9 = arith.constant 0 : index
    %c0_10 = arith.constant 0 : index
    %5 = vector.load %arg5[%c0_9, %c0_10] : memref<256x256xf32, #tpu.memory_space<vmem>>, vector<256x256xf32>
    %6 = arith.subf %1, %2 : vector<16x128xf32>
    %7 = arith.mulf %6, %6 : vector<16x128xf32>
    %8 = vector.shape_cast %7 : vector<16x128xf32> to vector<1x16x128xf32>
    %cst = arith.constant dense<0.000000e+00> : vector<1xf32>
    %9 = vector.multi_reduction <add>, %8, %cst [1, 2] : vector<1x16x128xf32> to vector<1xf32>
    %10 = vector.shape_cast %9 : vector<1xf32> to vector<1x1x1xf32>
    %11 = vector.extract %10[0, 0, 0] : f32 from vector<1x1x1xf32>
    %cst_11 = arith.constant 4.8828125E-4 : f32
    %12 = arith.mulf %11, %cst_11 : f32
    %13 = arith.subf %3, %4 : vector<16x128xf32>
    %14 = arith.subf %6, %13 : vector<16x128xf32>
    %15 = arith.mulf %14, %14 : vector<16x128xf32>
    %16 = vector.shape_cast %15 : vector<16x128xf32> to vector<1x16x128xf32>
    %cst_12 = arith.constant dense<0.000000e+00> : vector<1xf32>
    %17 = vector.multi_reduction <add>, %16, %cst_12 [1, 2] : vector<1x16x128xf32> to vector<1xf32>
    %18 = vector.shape_cast %17 : vector<1xf32> to vector<1x1x1xf32>
    %19 = vector.extract %18[0, 0, 0] : f32 from vector<1x1x1xf32>
    %cst_13 = arith.constant 4.8828125E-4 : f32
    %20 = arith.mulf %19, %cst_13 : f32
    %21 = tpu.iota {dimensions = array<i32: 1>} : vector<7x256xi32>
    %c1_i32 = arith.constant 1 : i32
    %22 = vector.broadcast %c1_i32 : i32 to vector<7x256xi32>
    %23 = arith.cmpi sge, %21, %22 : vector<7x256xi32>
    %c127_i32 = arith.constant 127 : i32
    %24 = vector.broadcast %c127_i32 : i32 to vector<7x256xi32>
    %25 = arith.cmpi sle, %21, %24 : vector<7x256xi32>
    %26 = arith.andi %23, %25 : vector<7x256xi1>
    %c0_i32 = arith.constant 0 : i32
    %27 = vector.broadcast %c0_i32 : i32 to vector<7x256xi32>
    %28 = arith.cmpi eq, %21, %27 : vector<7x256xi32>
    %c128_i32 = arith.constant 128 : i32
    %29 = vector.broadcast %c128_i32 : i32 to vector<7x256xi32>
    %30 = arith.cmpi eq, %21, %29 : vector<7x256xi32>
    %31 = arith.ori %28, %30 : vector<7x256xi1>
    %32 = vector.extract_strided_slice %0 {offsets = [0, 0], sizes = [8, 128], strides = [1, 1]} : vector<16x128xf32> to vector<8x128xf32>
    %33 = vector.extract_strided_slice %1 {offsets = [0, 0], sizes = [8, 128], strides = [1, 1]} : vector<16x128xf32> to vector<8x128xf32>
    %34 = vector.extract_strided_slice %2 {offsets = [0, 0], sizes = [8, 128], strides = [1, 1]} : vector<16x128xf32> to vector<8x128xf32>
    %35 = vector.extract_strided_slice %33 {offsets = [0, 0], sizes = [7, 128], strides = [1, 1]} : vector<8x128xf32> to vector<7x128xf32>
    %36 = vector.extract_strided_slice %33 {offsets = [1, 0], sizes = [7, 128], strides = [1, 1]} : vector<8x128xf32> to vector<7x128xf32>
    %37 = tpu.concatenate %35, %36 in 1 : vector<7x128xf32>, vector<7x128xf32> -> vector<7x256xf32>
    %38 = vector.extract_strided_slice %34 {offsets = [0, 0], sizes = [7, 128], strides = [1, 1]} : vector<8x128xf32> to vector<7x128xf32>
    %39 = vector.extract_strided_slice %34 {offsets = [1, 0], sizes = [7, 128], strides = [1, 1]} : vector<8x128xf32> to vector<7x128xf32>
    %40 = tpu.concatenate %38, %39 in 1 : vector<7x128xf32>, vector<7x128xf32> -> vector<7x256xf32>
    %cst_14 = arith.constant dense<0.000000e+00> : vector<7x256xf32>
    %41 = tpu.matmul %37, %5, %cst_14 {dimension_numbers = #tpu.dot_dimension_numbers<[1], [0], [0], [1], [0, 0, 1, 1], [], []>} : vector<7x256xf32>, vector<256x256xf32>, vector<7x256xf32> -> vector<7x256xf32>
    %cst_15 = arith.constant dense<0.000000e+00> : vector<7x256xf32>
    %42 = tpu.matmul %40, %5, %cst_15 {dimension_numbers = #tpu.dot_dimension_numbers<[1], [0], [0], [1], [0, 0, 1, 1], [], []>} : vector<7x256xf32>, vector<256x256xf32>, vector<7x256xf32> -> vector<7x256xf32>
    %43 = math.absf %41 : vector<7x256xf32>
    %44 = math.absf %42 : vector<7x256xf32>
    %45 = arith.subf %43, %44 : vector<7x256xf32>
    %c128_i32_16 = arith.constant 128 : i32
    %46 = tpu.dynamic_rotate %45 by %c128_i32_16 dim 1 : vector<7x256xf32>, i32 -> vector<7x256xf32>
    %47 = arith.addf %45, %46 : vector<7x256xf32>
    %48 = math.absf %47 : vector<7x256xf32>
    %cst_17 = arith.constant 0.000000e+00 : f32
    %49 = vector.broadcast %cst_17 : f32 to vector<7x256xf32>
    %50 = arith.select %26, %48, %49 : vector<7x256xi1>, vector<7x256xf32>
    %51 = vector.shape_cast %50 : vector<7x256xf32> to vector<1x7x256xf32>
    %cst_18 = arith.constant dense<0.000000e+00> : vector<1xf32>
    %52 = vector.multi_reduction <add>, %51, %cst_18 [1, 2] : vector<1x7x256xf32> to vector<1xf32>
    %53 = vector.shape_cast %52 : vector<1xf32> to vector<1x1x1xf32>
    %54 = vector.extract %53[0, 0, 0] : f32 from vector<1x1x1xf32>
    %55 = math.absf %45 : vector<7x256xf32>
    %cst_19 = arith.constant 0.000000e+00 : f32
    %56 = vector.broadcast %cst_19 : f32 to vector<7x256xf32>
    %57 = arith.select %31, %55, %56 : vector<7x256xi1>, vector<7x256xf32>
    %58 = vector.shape_cast %57 : vector<7x256xf32> to vector<1x7x256xf32>
    %cst_20 = arith.constant dense<0.000000e+00> : vector<1xf32>
    %59 = vector.multi_reduction <add>, %58, %cst_20 [1, 2] : vector<1x7x256xf32> to vector<1xf32>
    %60 = vector.shape_cast %59 : vector<1xf32> to vector<1x1x1xf32>
    %61 = vector.extract %60[0, 0, 0] : f32 from vector<1x1x1xf32>
    %62 = arith.addf %54, %61 : f32
    %cst_21 = arith.constant 0.000000e+00 : f32
    %63 = arith.addf %cst_21, %62 : f32
    %64 = arith.subf %32, %34 : vector<8x128xf32>
    %65 = arith.subf %32, %33 : vector<8x128xf32>
    %66 = arith.mulf %34, %34 : vector<8x128xf32>
    %67 = vector.shape_cast %66 : vector<8x128xf32> to vector<1x8x128xf32>
    %cst_22 = arith.constant dense<0.000000e+00> : vector<1xf32>
    %68 = vector.multi_reduction <add>, %67, %cst_22 [1, 2] : vector<1x8x128xf32> to vector<1xf32>
    %69 = vector.shape_cast %68 : vector<1xf32> to vector<1x1x1xf32>
    %70 = vector.extract %69[0, 0, 0] : f32 from vector<1x1x1xf32>
    %71 = arith.mulf %33, %33 : vector<8x128xf32>
    %72 = vector.shape_cast %71 : vector<8x128xf32> to vector<1x8x128xf32>
    %cst_23 = arith.constant dense<0.000000e+00> : vector<1xf32>
    %73 = vector.multi_reduction <add>, %72, %cst_23 [1, 2] : vector<1x8x128xf32> to vector<1xf32>
    %74 = vector.shape_cast %73 : vector<1xf32> to vector<1x1x1xf32>
    %75 = vector.extract %74[0, 0, 0] : f32 from vector<1x1x1xf32>
    %76 = arith.mulf %64, %64 : vector<8x128xf32>
    %77 = vector.shape_cast %76 : vector<8x128xf32> to vector<1x8x128xf32>
    %cst_24 = arith.constant dense<0.000000e+00> : vector<1xf32>
    %78 = vector.multi_reduction <add>, %77, %cst_24 [1, 2] : vector<1x8x128xf32> to vector<1xf32>
    %79 = vector.shape_cast %78 : vector<1xf32> to vector<1x1x1xf32>
    %80 = vector.extract %79[0, 0, 0] : f32 from vector<1x1x1xf32>
    %81 = arith.mulf %65, %65 : vector<8x128xf32>
    %82 = vector.shape_cast %81 : vector<8x128xf32> to vector<1x8x128xf32>
    %cst_25 = arith.constant dense<0.000000e+00> : vector<1xf32>
    %83 = vector.multi_reduction <add>, %82, %cst_25 [1, 2] : vector<1x8x128xf32> to vector<1xf32>
    %84 = vector.shape_cast %83 : vector<1xf32> to vector<1x1x1xf32>
    %85 = vector.extract %84[0, 0, 0] : f32 from vector<1x1x1xf32>
    %86 = arith.mulf %34, %33 : vector<8x128xf32>
    %87 = vector.shape_cast %86 : vector<8x128xf32> to vector<1x8x128xf32>
    %cst_26 = arith.constant dense<0.000000e+00> : vector<1xf32>
    %88 = vector.multi_reduction <add>, %87, %cst_26 [1, 2] : vector<1x8x128xf32> to vector<1xf32>
    %89 = vector.shape_cast %88 : vector<1xf32> to vector<1x1x1xf32>
    %90 = vector.extract %89[0, 0, 0] : f32 from vector<1x1x1xf32>
    %91 = arith.mulf %64, %65 : vector<8x128xf32>
    %92 = vector.shape_cast %91 : vector<8x128xf32> to vector<1x8x128xf32>
    %cst_27 = arith.constant dense<0.000000e+00> : vector<1xf32>
    %93 = vector.multi_reduction <add>, %92, %cst_27 [1, 2] : vector<1x8x128xf32> to vector<1xf32>
    %94 = vector.shape_cast %93 : vector<1xf32> to vector<1x1x1xf32>
    %95 = vector.extract %94[0, 0, 0] : f32 from vector<1x1x1xf32>
    %cst_28 = arith.constant 0.000000e+00 : f32
    %96 = arith.subf %cst_28, %90 : f32
    %97 = arith.mulf %70, %75 : f32
    %98 = math.sqrt %97 : f32
    %cst_29 = arith.constant 9.99999993E-9 : f32
    %99 = arith.addf %98, %cst_29 : f32
    %100 = arith.divf %96, %99 : f32
    %cst_30 = arith.constant 0.000000e+00 : f32
    %101 = arith.subf %cst_30, %95 : f32
    %102 = arith.mulf %80, %85 : f32
    %103 = math.sqrt %102 : f32
    %cst_31 = arith.constant 9.99999993E-9 : f32
    %104 = arith.addf %103, %cst_31 : f32
    %105 = arith.divf %101, %104 : f32
    %106 = arith.addf %70, %80 : f32
    %cst_32 = arith.constant 9.99999993E-9 : f32
    %107 = arith.addf %106, %cst_32 : f32
    %108 = arith.divf %70, %107 : f32
    %109 = arith.mulf %108, %100 : f32
    %cst_33 = arith.constant 0.000000e+00 : f32
    %110 = arith.addf %cst_33, %109 : f32
    %cst_34 = arith.constant 1.000000e+00 : f32
    %111 = arith.subf %cst_34, %108 : f32
    %112 = arith.mulf %111, %105 : f32
    %113 = arith.addf %110, %112 : f32
    %114 = vector.extract_strided_slice %0 {offsets = [8, 0], sizes = [8, 128], strides = [1, 1]} : vector<16x128xf32> to vector<8x128xf32>
    %115 = vector.extract_strided_slice %1 {offsets = [8, 0], sizes = [8, 128], strides = [1, 1]} : vector<16x128xf32> to vector<8x128xf32>
    %116 = vector.extract_strided_slice %2 {offsets = [8, 0], sizes = [8, 128], strides = [1, 1]} : vector<16x128xf32> to vector<8x128xf32>
    %117 = vector.extract_strided_slice %115 {offsets = [0, 0], sizes = [7, 128], strides = [1, 1]} : vector<8x128xf32> to vector<7x128xf32>
    %118 = vector.extract_strided_slice %115 {offsets = [1, 0], sizes = [7, 128], strides = [1, 1]} : vector<8x128xf32> to vector<7x128xf32>
    %119 = tpu.concatenate %117, %118 in 1 : vector<7x128xf32>, vector<7x128xf32> -> vector<7x256xf32>
    %120 = vector.extract_strided_slice %116 {offsets = [0, 0], sizes = [7, 128], strides = [1, 1]} : vector<8x128xf32> to vector<7x128xf32>
    %121 = vector.extract_strided_slice %116 {offsets = [1, 0], sizes = [7, 128], strides = [1, 1]} : vector<8x128xf32> to vector<7x128xf32>
    %122 = tpu.concatenate %120, %121 in 1 : vector<7x128xf32>, vector<7x128xf32> -> vector<7x256xf32>
    %cst_35 = arith.constant dense<0.000000e+00> : vector<7x256xf32>
    %123 = tpu.matmul %119, %5, %cst_35 {dimension_numbers = #tpu.dot_dimension_numbers<[1], [0], [0], [1], [0, 0, 1, 1], [], []>} : vector<7x256xf32>, vector<256x256xf32>, vector<7x256xf32> -> vector<7x256xf32>
    %cst_36 = arith.constant dense<0.000000e+00> : vector<7x256xf32>
    %124 = tpu.matmul %122, %5, %cst_36 {dimension_numbers = #tpu.dot_dimension_numbers<[1], [0], [0], [1], [0, 0, 1, 1], [], []>} : vector<7x256xf32>, vector<256x256xf32>, vector<7x256xf32> -> vector<7x256xf32>
    %125 = math.absf %123 : vector<7x256xf32>
    %126 = math.absf %124 : vector<7x256xf32>
    %127 = arith.subf %125, %126 : vector<7x256xf32>
    %c128_i32_37 = arith.constant 128 : i32
    %128 = tpu.dynamic_rotate %127 by %c128_i32_37 dim 1 : vector<7x256xf32>, i32 -> vector<7x256xf32>
    %129 = arith.addf %127, %128 : vector<7x256xf32>
    %130 = math.absf %129 : vector<7x256xf32>
    %cst_38 = arith.constant 0.000000e+00 : f32
    %131 = vector.broadcast %cst_38 : f32 to vector<7x256xf32>
    %132 = arith.select %26, %130, %131 : vector<7x256xi1>, vector<7x256xf32>
    %133 = vector.shape_cast %132 : vector<7x256xf32> to vector<1x7x256xf32>
    %cst_39 = arith.constant dense<0.000000e+00> : vector<1xf32>
    %134 = vector.multi_reduction <add>, %133, %cst_39 [1, 2] : vector<1x7x256xf32> to vector<1xf32>
    %135 = vector.shape_cast %134 : vector<1xf32> to vector<1x1x1xf32>
    %136 = vector.extract %135[0, 0, 0] : f32 from vector<1x1x1xf32>
    %137 = math.absf %127 : vector<7x256xf32>
    %cst_40 = arith.constant 0.000000e+00 : f32
    %138 = vector.broadcast %cst_40 : f32 to vector<7x256xf32>
    %139 = arith.select %31, %137, %138 : vector<7x256xi1>, vector<7x256xf32>
    %140 = vector.shape_cast %139 : vector<7x256xf32> to vector<1x7x256xf32>
    %cst_41 = arith.constant dense<0.000000e+00> : vector<1xf32>
    %141 = vector.multi_reduction <add>, %140, %cst_41 [1, 2] : vector<1x7x256xf32> to vector<1xf32>
    %142 = vector.shape_cast %141 : vector<1xf32> to vector<1x1x1xf32>
    %143 = vector.extract %142[0, 0, 0] : f32 from vector<1x1x1xf32>
    %144 = arith.addf %136, %143 : f32
    %145 = arith.addf %63, %144 : f32
    %146 = arith.subf %114, %116 : vector<8x128xf32>
    %147 = arith.subf %114, %115 : vector<8x128xf32>
    %148 = arith.mulf %116, %116 : vector<8x128xf32>
    %149 = vector.shape_cast %148 : vector<8x128xf32> to vector<1x8x128xf32>
    %cst_42 = arith.constant dense<0.000000e+00> : vector<1xf32>
    %150 = vector.multi_reduction <add>, %149, %cst_42 [1, 2] : vector<1x8x128xf32> to vector<1xf32>
    %151 = vector.shape_cast %150 : vector<1xf32> to vector<1x1x1xf32>
    %152 = vector.extract %151[0, 0, 0] : f32 from vector<1x1x1xf32>
    %153 = arith.mulf %115, %115 : vector<8x128xf32>
    %154 = vector.shape_cast %153 : vector<8x128xf32> to vector<1x8x128xf32>
    %cst_43 = arith.constant dense<0.000000e+00> : vector<1xf32>
    %155 = vector.multi_reduction <add>, %154, %cst_43 [1, 2] : vector<1x8x128xf32> to vector<1xf32>
    %156 = vector.shape_cast %155 : vector<1xf32> to vector<1x1x1xf32>
    %157 = vector.extract %156[0, 0, 0] : f32 from vector<1x1x1xf32>
    %158 = arith.mulf %146, %146 : vector<8x128xf32>
    %159 = vector.shape_cast %158 : vector<8x128xf32> to vector<1x8x128xf32>
    %cst_44 = arith.constant dense<0.000000e+00> : vector<1xf32>
    %160 = vector.multi_reduction <add>, %159, %cst_44 [1, 2] : vector<1x8x128xf32> to vector<1xf32>
    %161 = vector.shape_cast %160 : vector<1xf32> to vector<1x1x1xf32>
    %162 = vector.extract %161[0, 0, 0] : f32 from vector<1x1x1xf32>
    %163 = arith.mulf %147, %147 : vector<8x128xf32>
    %164 = vector.shape_cast %163 : vector<8x128xf32> to vector<1x8x128xf32>
    %cst_45 = arith.constant dense<0.000000e+00> : vector<1xf32>
    %165 = vector.multi_reduction <add>, %164, %cst_45 [1, 2] : vector<1x8x128xf32> to vector<1xf32>
    %166 = vector.shape_cast %165 : vector<1xf32> to vector<1x1x1xf32>
    %167 = vector.extract %166[0, 0, 0] : f32 from vector<1x1x1xf32>
    %168 = arith.mulf %116, %115 : vector<8x128xf32>
    %169 = vector.shape_cast %168 : vector<8x128xf32> to vector<1x8x128xf32>
    %cst_46 = arith.constant dense<0.000000e+00> : vector<1xf32>
    %170 = vector.multi_reduction <add>, %169, %cst_46 [1, 2] : vector<1x8x128xf32> to vector<1xf32>
    %171 = vector.shape_cast %170 : vector<1xf32> to vector<1x1x1xf32>
    %172 = vector.extract %171[0, 0, 0] : f32 from vector<1x1x1xf32>
    %173 = arith.mulf %146, %147 : vector<8x128xf32>
    %174 = vector.shape_cast %173 : vector<8x128xf32> to vector<1x8x128xf32>
    %cst_47 = arith.constant dense<0.000000e+00> : vector<1xf32>
    %175 = vector.multi_reduction <add>, %174, %cst_47 [1, 2] : vector<1x8x128xf32> to vector<1xf32>
    %176 = vector.shape_cast %175 : vector<1xf32> to vector<1x1x1xf32>
    %177 = vector.extract %176[0, 0, 0] : f32 from vector<1x1x1xf32>
    %cst_48 = arith.constant 0.000000e+00 : f32
    %178 = arith.subf %cst_48, %172 : f32
    %179 = arith.mulf %152, %157 : f32
    %180 = math.sqrt %179 : f32
    %cst_49 = arith.constant 9.99999993E-9 : f32
    %181 = arith.addf %180, %cst_49 : f32
    %182 = arith.divf %178, %181 : f32
    %cst_50 = arith.constant 0.000000e+00 : f32
    %183 = arith.subf %cst_50, %177 : f32
    %184 = arith.mulf %162, %167 : f32
    %185 = math.sqrt %184 : f32
    %cst_51 = arith.constant 9.99999993E-9 : f32
    %186 = arith.addf %185, %cst_51 : f32
    %187 = arith.divf %183, %186 : f32
    %188 = arith.addf %152, %162 : f32
    %cst_52 = arith.constant 9.99999993E-9 : f32
    %189 = arith.addf %188, %cst_52 : f32
    %190 = arith.divf %152, %189 : f32
    %191 = arith.mulf %190, %182 : f32
    %192 = arith.addf %113, %191 : f32
    %cst_53 = arith.constant 1.000000e+00 : f32
    %193 = arith.subf %cst_53, %190 : f32
    %194 = arith.mulf %193, %187 : f32
    %195 = arith.addf %192, %194 : f32
    %cst_54 = arith.constant 4.8828125E-4 : f32
    %196 = arith.mulf %145, %cst_54 : f32
    %cst_55 = arith.constant 8.000000e-01 : f32
    %197 = arith.mulf %cst_55, %12 : f32
    %cst_56 = arith.constant 2.000000e-01 : f32
    %198 = arith.mulf %cst_56, %196 : f32
    %199 = arith.addf %197, %198 : f32
    %cst_57 = arith.constant 6.000000e+02 : f32
    %200 = arith.divf %199, %cst_57 : f32
    %cst_58 = arith.constant 2.000000e+00 : f32
    %201 = arith.divf %195, %cst_58 : f32
    %202 = arith.addf %200, %201 : f32
    %cst_59 = arith.constant 1.000000e+00 : f32
    %203 = arith.mulf %cst_59, %20 : f32
    %204 = arith.addf %202, %203 : f32
    %c0_60 = arith.constant 0 : index
    %c0_61 = arith.constant 0 : index
    %205 = memref.load %arg6[%c0_60, %c0_61] : memref<1x1xf32, #tpu.memory_space<smem>>
    memref.store %204, %arg6[%c0_60, %c0_61] : memref<1x1xf32, #tpu.memory_space<smem>>
    return
  }
}

</mosaic_0001>

<bundles_post_ra>
// kernel: tpu_custom_call.1
= control target key start
LH: loop header
LB: loop body
LE: loop exit
PB: predicated region body
PF: predicated region fallthrough
CT: control target
= control target key end

     0   :  { %11 = vsyncpa [#allocation3], 0  ;;  %s1808_s0 = inlined_call_operand.hbm [shape: f32[16,128], index: 0, kind: input, shape index: {}]   ;;  %s1809_s1 = inlined_call_operand.hbm [shape: f32[16,128], index: 1, kind: input, shape index: {}]   ;;  %s1810_s2 = inlined_call_operand.hbm [shape: f32[16,128], index: 2, kind: input, shape index: {}]   ;;  %s1811_s3 = inlined_call_operand.hbm [shape: f32[16,128], index: 3, kind: input, shape index: {}]   ;;  %s1812_s4 = inlined_call_operand.hbm [shape: f32[16,128], index: 4, kind: input, shape index: {}]   ;;  %s1813_s5 = inlined_call_operand.hbm [shape: f32[256,256], index: 5, kind: input, shape index: {}]   ;;  %s1814_s6 = inlined_call_operand.hbm [shape: f32[1,1], index: 6, kind: output, shape index: {}]  }
   0x1   :  { %12 = vsyncpa [#allocation6], 0 }
   0x2   :  { %13 = vsyncpa [#allocation9], 0 }
   0x3   :  { %14 = vsyncpa [#allocation12], 0 }
   0x4   :  { %15 = vsyncpa [#allocation4], 0  ;;  %s1340_s21 = smov [#allocation5]   ;;  %s1341_s23 = smov [#allocation8]  }
   0x5   :  { %s33_s22 = sshll.u32 %s1340_s21, 4  ;;  %s57_s24 = sshll.u32 %s1341_s23, 4  ;;  %s34_s22 = int_to_ptr.vmem [resolvable:$true] %s33_s22  ;;  %s1386_s24 = int_to_ptr.vmem [resolvable:$true] %s57_s24 }
   0x6   :  { %s1188_s27 = scalar_lea.hbm %s1809_s1, 256 }
   0x7   :  { %p1189_p0 = scmp.ne.s32.totalorder %s1809_s1, %s1188_s27  ;;  %p1192_p1 = scmp.lt.u32.totalorder %s1188_s27, %s1809_s1 }
   0x9   :  { %p1194_p2 = pnand %p1192_p1, %p1189_p0 }
   0xb   :  { %1197 = shalt.err (!%p1194_p2)
}
   0xc   :  { %s1198_s8 = scalar_lea.vmem %s34_s22, 256  ;;  %p1203_p4 = scmp.lt.s32.totalorder %s34_s22, %s34_s22 }
   0xd   :  { %p1199_p3 = scmp.ne.s32.totalorder %s34_s22, %s1198_s8  ;;  %p1204_p5 = scmp.lt.s32.totalorder %s1198_s8, %s1198_s8 }
   0xf   :  { %p1205_p6 = por %p1204_p5, %p1203_p4 }
  0x11   :  { %p1206_p7 = pnand %p1205_p6, %p1199_p3 }
  0x13   :  { %1209 = shalt.err (!%p1206_p7)
}
  0x14   :  { %s1342_s9 = smov 128   ;;  %s1343_s10 = smov 8  }
  0x15   :  { %39 = dma.hbm_to_vmem [thread:$0]  %s1809_s1, 256, %s34_s22, [#allocation6], %s1342_s9, %s1342_s9, %s1343_s10  }
  0x16   :  { %s1210_s15 = scalar_lea.hbm %s1811_s3, 256 }
  0x17   :  { %p1211_p8 = scmp.ne.s32.totalorder %s1811_s3, %s1210_s15  ;;  %p1214_p9 = scmp.lt.u32.totalorder %s1210_s15, %s1811_s3 }
  0x19   :  { %p1216_p10 = pnand %p1214_p9, %p1211_p8 }
  0x1b   :  { %1219 = shalt.err (!%p1216_p10)
}
  0x1c   :  { %s1220_s20 = scalar_lea.vmem %s1386_s24, 256  ;;  %p1225_p12 = scmp.lt.s32.totalorder %s1386_s24, %s1386_s24 }
  0x1d   :  { %p1221_p11 = scmp.ne.s32.totalorder %s1386_s24, %s1220_s20  ;;  %p1226_p13 = scmp.lt.s32.totalorder %s1220_s20, %s1220_s20 }
  0x1f   :  { %p1227_p0 = por %p1226_p13, %p1225_p12 }
  0x21   :  { %p1228_p1 = pnand %p1227_p0, %p1221_p11 }
  0x23   :  { %1231 = shalt.err (!%p1228_p1)
}
  0x24   :  { %63 = dma.hbm_to_vmem [thread:$0]  %s1811_s3, 256, %s1386_s24, [#allocation9], %s1342_s9, %s1342_s9, %s1343_s10  }
  0x25   :  { %s1344_s22 = smov [#allocation2]   ;;  %s1345_s25 = smov [#allocation7]  }
  0x26   :  { %s21_s23 = sshll.u32 %s1344_s22, 4  ;;  %s45_s26 = sshll.u32 %s1345_s25, 4  ;;  %s22_s23 = int_to_ptr.vmem [resolvable:$true] %s21_s23  ;;  %s1423_s26 = int_to_ptr.vmem [resolvable:$true] %s45_s26 }
  0x27   :  { %s1232_s29 = scalar_lea.hbm %s1808_s0, 256 }
  0x28   :  { %p1233_p2 = scmp.ne.s32.totalorder %s1808_s0, %s1232_s29  ;;  %p1236_p3 = scmp.lt.u32.totalorder %s1232_s29, %s1808_s0 }
  0x2a   :  { %p1238_p4 = pnand %p1236_p3, %p1233_p2 }
  0x2c   :  { %1241 = shalt.err (!%p1238_p4)
}
  0x2d   :  { %s1242_s3 = scalar_lea.vmem %s22_s23, 256  ;;  %p1247_p6 = scmp.lt.s32.totalorder %s22_s23, %s22_s23 }
  0x2e   :  { %p1243_p5 = scmp.ne.s32.totalorder %s22_s23, %s1242_s3  ;;  %p1248_p7 = scmp.lt.s32.totalorder %s1242_s3, %s1242_s3 }
  0x30   :  { %p1249_p8 = por %p1248_p7, %p1247_p6 }
  0x32   :  { %p1250_p9 = pnand %p1249_p8, %p1243_p5 }
  0x34   :  { %1253 = shalt.err (!%p1250_p9)
}
  0x35   :  { %27 = dma.hbm_to_vmem [thread:$0]  %s1808_s0, 256, %s22_s23, [#allocation3], %s1342_s9, %s1342_s9, %s1343_s10  }
  0x36   :  { %s1254_s15 = scalar_lea.hbm %s1810_s2, 256 }
  0x37   :  { %p1255_p10 = scmp.ne.s32.totalorder %s1810_s2, %s1254_s15  ;;  %p1258_p11 = scmp.lt.u32.totalorder %s1254_s15, %s1810_s2 }
  0x39   :  { %p1260_p12 = pnand %p1258_p11, %p1255_p10 }
  0x3b   :  { %1263 = shalt.err (!%p1260_p12)
}
  0x3c   :  { %s1264_s20 = scalar_lea.vmem %s1423_s26, 256  ;;  %p1269_p0 = scmp.lt.s32.totalorder %s1423_s26, %s1423_s26 }
  0x3d   :  { %p1265_p13 = scmp.ne.s32.totalorder %s1423_s26, %s1264_s20  ;;  %p1270_p1 = scmp.lt.s32.totalorder %s1264_s20, %s1264_s20 }
  0x3f   :  { %p1271_p2 = por %p1270_p1, %p1269_p0 }
  0x41   :  { %p1272_p3 = pnand %p1271_p2, %p1265_p13 }
  0x43   :  { %1275 = shalt.err (!%p1272_p3)
}
  0x44   :  { %51 = dma.hbm_to_vmem [thread:$0]  %s1810_s2, 256, %s1423_s26, [#allocation6], %s1342_s9, %s1342_s9, %s1343_s10  }
  0x45   :  { %s1346_s21 = smov [#allocation10]   ;;  %s1347_s23 = smov [#allocation11]  }
  0x46   :  { %s69_s22 = sshll.u32 %s1346_s21, 4  ;;  %s81_s25 = sshll.u32 %s1347_s23, 4  ;;  %s70_s22 = int_to_ptr.vmem [resolvable:$true] %s69_s22  ;;  %s1460_s25 = int_to_ptr.vmem [resolvable:$true] %s81_s25 }
  0x47   :  { %s1276_s29 = scalar_lea.hbm %s1812_s4, 256 }
  0x48   :  { %p1277_p4 = scmp.ne.s32.totalorder %s1812_s4, %s1276_s29  ;;  %p1280_p5 = scmp.lt.u32.totalorder %s1276_s29, %s1812_s4 }
  0x4a   :  { %p1282_p6 = pnand %p1280_p5, %p1277_p4 }
  0x4c   :  { %1285 = shalt.err (!%p1282_p6)
}
  0x4d   :  { %s1286_s2 = scalar_lea.vmem %s70_s22, 256  ;;  %p1291_p8 = scmp.lt.s32.totalorder %s70_s22, %s70_s22 }
  0x4e   :  { %p1287_p7 = scmp.ne.s32.totalorder %s70_s22, %s1286_s2  ;;  %p1292_p9 = scmp.lt.s32.totalorder %s1286_s2, %s1286_s2 }
  0x50   :  { %p1293_p10 = por %p1292_p9, %p1291_p8 }
  0x52   :  { %p1294_p11 = pnand %p1293_p10, %p1287_p7 }
  0x54   :  { %1297 = shalt.err (!%p1294_p11)
}
  0x55   :  { %75 = dma.hbm_to_vmem [thread:$0]  %s1812_s4, 256, %s70_s22, [#allocation9], %s1342_s9, %s1342_s9, %s1343_s10  }
  0x56   :  { %s1298_s13 = scalar_lea.hbm %s1813_s5, 8192 }
  0x57   :  { %p1299_p12 = scmp.ne.s32.totalorder %s1813_s5, %s1298_s13  ;;  %p1302_p13 = scmp.lt.u32.totalorder %s1298_s13, %s1813_s5 }
  0x59   :  { %p1304_p0 = pnand %p1302_p13, %p1299_p12 }
  0x5b   :  { %1307 = shalt.err (!%p1304_p0)
}
  0x5c   :  { %s1308_s18 = scalar_lea.vmem %s1460_s25, 8192  ;;  %p1313_p2 = scmp.lt.s32.totalorder %s1460_s25, %s1460_s25 }
  0x5d   :  { %p1309_p1 = scmp.ne.s32.totalorder %s1460_s25, %s1308_s18  ;;  %p1314_p3 = scmp.lt.s32.totalorder %s1308_s18, %s1308_s18 }
  0x5f   :  { %p1315_p4 = por %p1314_p3, %p1313_p2 }
  0x61   :  { %p1316_p5 = pnand %p1315_p4, %p1309_p1 }
  0x63   :  { %1319 = shalt.err (!%p1316_p5)
}
  0x64   :  { %s1348_s4 = smov 256   ;;  %s1349_s9 = smov 16  }
  0x65   :  { %87 = dma.hbm_to_vmem [thread:$0]  %s1813_s5, 8192, %s1460_s25, [#allocation12], %s1348_s4, %s1348_s4, %s1349_s9  }
  0x66   :  { %1330 = dma.done.wait [#allocation3], 256  }
  0x67   :  { %1331 = vsyncadd [#allocation3], 4294967040 }
  0x68   :  { %1332 = dma.done.wait [#allocation6], 512  }
  0x69   :  { %1333 = vsyncadd [#allocation6], 4294966784 }
  0x6a   :  { %1334 = dma.done.wait [#allocation9], 512  }
  0x6b   :  { %1335 = vsyncadd [#allocation9], 4294966784 }
  0x6c   :  { %1336 = dma.done.wait [#allocation12], 8192  }
  0x6d   :  { %1337 = vsyncadd [#allocation12], 4294959104  ;;  %v117_v0 = vld [vmem:[#allocation11 + $0x8] sm:$0xff]  ;;  %v119_v1 = vld [vmem:[#allocation11 + $0x18] sm:$0xff]  ;;  %vm385_vm1 = vcmask 1046528  }
  0x6e   :  { %v116_v2 = vld [vmem:[#allocation11] sm:$0xff]  ;;  %v1494_v3 = vpack.c.bf16 %v119_v1, %v117_v0  ;;  %v118_v4 = vld [vmem:[#allocation11 + $0x10] sm:$0xff]  ;;  %v121_v5 = vld [vmem:[#allocation11 + $0x28] sm:$0xff] }
  0x6f   :  { %v123_v6 = vld [vmem:[#allocation11 + $0x38] sm:$0xff]  ;;  %v1496_v7 = vpack.c.bf16 %v118_v4, %v116_v2  ;;  %v120_v9 = vld [vmem:[#allocation11 + $0x20] sm:$0xff]  ;;  %v122_v10 = vld [vmem:[#allocation11 + $0x30] sm:$0xff] }
  0x70   :  { %v1498_v8 = vpack.c.bf16 %v123_v6, %v121_v5  ;;  %v125_v11 = vld [vmem:[#allocation11 + $0x48] sm:$0xff]  ;;  %846 = vmatprep.subr.bf16.mxu0 %v1494_v3  ;;  %910 = vmatprep.subr.bf16.mxu1 %v1494_v3  ;;  %v127_v12 = vld [vmem:[#allocation11 + $0x58] sm:$0xff]  ;;  %v1504_v13 = vpack.c.bf16 %v122_v10, %v120_v9  ;;  %v124_v15 = vld [vmem:[#allocation11 + $0x40] sm:$0xff] }
  0x71   :  { %848 = vmatpush1.bf16.msra.mxu0 %v1496_v7  ;;  %912 = vmatpush1.bf16.msra.mxu1 %v1496_v7  ;;  %v1508_v14 = vpack.c.bf16 %v127_v12, %v125_v11  ;;  %v126_v16 = vld [vmem:[#allocation11 + $0x50] sm:$0xff]  ;;  %v129_v17 = vld [vmem:[#allocation11 + $0x68] sm:$0xff]  ;;  %v131_v18 = vld [vmem:[#allocation11 + $0x78] sm:$0xff] }
  0x72   :  { %850 = vmatprep.subr.bf16.mxu0 %v1498_v8  ;;  %914 = vmatprep.subr.bf16.mxu1 %v1498_v8  ;;  %v1512_v19 = vpack.c.bf16 %v126_v16, %v124_v15  ;;  %v1516_v20 = vpack.c.bf16 %v131_v18, %v129_v17  ;;  %v128_v21 = vld [vmem:[#allocation11 + $0x60] sm:$0xff]  ;;  %v130_v22 = vld [vmem:[#allocation11 + $0x70] sm:$0xff]  ;;  %v133_v23 = vld [vmem:[#allocation11 + $0x88] sm:$0xff] }
  0x73   :  { %v135_v24 = vld [vmem:[#allocation11 + $0x98] sm:$0xff]  ;;  %v1520_v25 = vpack.c.bf16 %v130_v22, %v128_v21  ;;  %v132_v27 = vld [vmem:[#allocation11 + $0x80] sm:$0xff]  ;;  %v134_v28 = vld [vmem:[#allocation11 + $0x90] sm:$0xff] }
  0x74   :  { %v1524_v26 = vpack.c.bf16 %v135_v24, %v133_v23  ;;  %v137_v29 = vld [vmem:[#allocation11 + $0xa8] sm:$0xff]  ;;  %v139_v30 = vld [vmem:[#allocation11 + $0xb8] sm:$0xff]  ;;  %v1528_v31 = vpack.c.bf16 %v134_v28, %v132_v27  ;;  %v136_v33 = vld [vmem:[#allocation11 + $0xa0] sm:$0xff] }
  0x75   :  { %852 = vmatpush1.bf16.msra.mxu0 %v1504_v13  ;;  %916 = vmatpush1.bf16.msra.mxu1 %v1504_v13  ;;  %v1532_v32 = vpack.c.bf16 %v139_v30, %v137_v29  ;;  %v138_v34 = vld [vmem:[#allocation11 + $0xb0] sm:$0xff]  ;;  %v141_v35 = vld [vmem:[#allocation11 + $0xc8] sm:$0xff]  ;;  %v143_v36 = vld [vmem:[#allocation11 + $0xd8] sm:$0xff] }
  0x76   :  { %854 = vmatprep.subr.bf16.mxu0 %v1508_v14  ;;  %918 = vmatprep.subr.bf16.mxu1 %v1508_v14  ;;  %v1536_v37 = vpack.c.bf16 %v138_v34, %v136_v33  ;;  %v140_v38 = vld [vmem:[#allocation11 + $0xc0] sm:$0xff]  ;;  %v1540_v39 = vpack.c.bf16 %v143_v36, %v141_v35  ;;  %v142_v40 = vld [vmem:[#allocation11 + $0xd0] sm:$0xff]  ;;  %v145_v43 = vld [vmem:[#allocation11 + $0xe8] sm:$0xff] }
  0x77   :  { %v1542_v41 = vld [vmem:[#allocation5] sm:$0xff]  ;;  %v1544_v42 = vld [vmem:[#allocation7] sm:$0xff]  ;;  %v147_v44 = vld [vmem:[#allocation11 + $0xf8] sm:$0xff]  ;;  %v1550_v47 = vpack.c.bf16 %v142_v40, %v140_v38 }
  0x78   :  { %v228_v45 = vrot.slane %v1542_v41, 1  ;;  %v231_v46 = vrot.slane %v1544_v42, 1  ;;  %v1554_v48 = vpack.c.bf16 %v147_v44, %v145_v43  ;;  %v144_v49 = vld [vmem:[#allocation11 + $0xe0] sm:$0xff]  ;;  %v146_v50 = vld [vmem:[#allocation11 + $0xf0] sm:$0xff]  ;;  %v149_v51 = vld [vmem:[#allocation11 + $0x108] sm:$0xff] }
  0x79   :  { %856 = vmatpush1.bf16.msra.mxu0 %v1512_v19  ;;  %920 = vmatpush1.bf16.msra.mxu1 %v1512_v19  ;;  %v151_v52 = vld [vmem:[#allocation11 + $0x118] sm:$0xff]  ;;  %v1558_v53 = vpack.c.bf16 %v146_v50, %v144_v49  ;;  %v148_v55 = vld [vmem:[#allocation11 + $0x100] sm:$0xff]  ;;  %v150_v56 = vld [vmem:[#allocation11 + $0x110] sm:$0xff] }
  0x7a   :  { %858 = vmatprep.subr.bf16.mxu0 %v1516_v20  ;;  %922 = vmatprep.subr.bf16.mxu1 %v1516_v20  ;;  %v1562_v54 = vpack.c.bf16 %v151_v52, %v149_v51  ;;  %v153_v57 = vld [vmem:[#allocation11 + $0x128] sm:$0xff]  ;;  %v155_v58 = vld [vmem:[#allocation11 + $0x138] sm:$0xff]  ;;  %v1566_v59 = vpack.c.bf16 %v150_v56, %v148_v55  ;;  %v152_v61 = vld [vmem:[#allocation11 + $0x120] sm:$0xff] }
  0x7b   :  { %297 = vmatprep.mubr.f32.mxu0 %v228_v45  ;;  %368 = vmatprep.mubr.f32.mxu1 %v231_v46  ;;  %v1570_v60 = vpack.c.bf16 %v155_v58, %v153_v57  ;;  %v154_v62 = vld [vmem:[#allocation11 + $0x130] sm:$0xff]  ;;  %v157_v63 = vld [vmem:[#allocation11 + $0x148] sm:$0xff]  ;;  %v159_v0 = vld [vmem:[#allocation11 + $0x158] sm:$0xff] }
  0x7c   :  { %v1574_v1 = vpack.c.bf16 %v154_v62, %v152_v61  ;;  %v1578_v2 = vpack.c.bf16 %v159_v0, %v157_v63  ;;  %v156_v4 = vld [vmem:[#allocation11 + $0x140] sm:$0xff]  ;;  %v158_v5 = vld [vmem:[#allocation11 + $0x150] sm:$0xff]  ;;  %v161_v6 = vld [vmem:[#allocation11 + $0x168] sm:$0xff]  ;;  %v458_v0 = vmul.f32 %v1544_v42, %v1542_v41 }
  0x7d   :  { %860 = vmatpush1.bf16.msra.mxu0 %v1520_v25  ;;  %924 = vmatpush1.bf16.msra.mxu1 %v1520_v25  ;;  %v163_v9 = vld [vmem:[#allocation11 + $0x178] sm:$0xff]  ;;  %v1582_v10 = vpack.c.bf16 %v158_v5, %v156_v4  ;;  %v160_v12 = vld [vmem:[#allocation11 + $0x160] sm:$0xff]  ;;  %v162_v15 = vld [vmem:[#allocation11 + $0x170] sm:$0xff] }
  0x7e   :  { %862 = vmatprep.subr.bf16.mxu0 %v1524_v26  ;;  %926 = vmatprep.subr.bf16.mxu1 %v1524_v26  ;;  %v1586_v11 = vpack.c.bf16 %v163_v9, %v161_v6  ;;  %v165_v16 = vld [vmem:[#allocation11 + $0x188] sm:$0xff]  ;;  %v167_v17 = vld [vmem:[#allocation11 + $0x198] sm:$0xff]  ;;  %v1590_v18 = vpack.c.bf16 %v162_v15, %v160_v12  ;;  %v164_v22 = vld [vmem:[#allocation11 + $0x180] sm:$0xff] }
  0x7f   :  { %v1594_v21 = vpack.c.bf16 %v167_v17, %v165_v16  ;;  %v166_v23 = vld [vmem:[#allocation11 + $0x190] sm:$0xff]  ;;  %v169_v24 = vld [vmem:[#allocation11 + $0x1a8] sm:$0xff]  ;;  %v171_v27 = vld [vmem:[#allocation11 + $0x1b8] sm:$0xff] }
  0x80   :  { %v1598_v28 = vpack.c.bf16 %v166_v23, %v164_v22  ;;  %v1602_v29 = vpack.c.bf16 %v171_v27, %v169_v24  ;;  %v168_v30 = vld [vmem:[#allocation11 + $0x1a0] sm:$0xff]  ;;  %v170_v33 = vld [vmem:[#allocation11 + $0x1b0] sm:$0xff]  ;;  %v173_v34 = vld [vmem:[#allocation11 + $0x1c8] sm:$0xff] }
  0x81   :  { %864 = vmatpush1.bf16.msra.mxu0 %v1528_v31  ;;  %928 = vmatpush1.bf16.msra.mxu1 %v1528_v31  ;;  %v175_v35 = vld [vmem:[#allocation11 + $0x1d8] sm:$0xff]  ;;  %v1606_v36 = vpack.c.bf16 %v170_v33, %v168_v30  ;;  %v172_v40 = vld [vmem:[#allocation11 + $0x1c0] sm:$0xff]  ;;  %v174_v43 = vld [vmem:[#allocation11 + $0x1d0] sm:$0xff] }
  0x82   :  { %866 = vmatprep.subr.bf16.mxu0 %v1532_v32  ;;  %930 = vmatprep.subr.bf16.mxu1 %v1532_v32  ;;  %v1610_v38 = vpack.c.bf16 %v175_v35, %v173_v34  ;;  %v177_v44 = vld [vmem:[#allocation11 + $0x1e8] sm:$0xff]  ;;  %v179_v45 = vld [vmem:[#allocation11 + $0x1f8] sm:$0xff]  ;;  %v1614_v46 = vpack.c.bf16 %v174_v43, %v172_v40  ;;  %v176_v50 = vld [vmem:[#allocation11 + $0x1e0] sm:$0xff]  ;;  %v428_v35 = vmul.f32 %v1542_v41, %v1542_v41 }
  0x83   :  { %v1618_v49 = vpack.c.bf16 %v179_v45, %v177_v44  ;;  %v178_v51 = vld [vmem:[#allocation11 + $0x1f0] sm:$0xff]  ;;  %v1626_v55 = vld [vmem:[#allocation5 + $0x8] sm:$0xff]  ;;  %v1628_v56 = vld [vmem:[#allocation7 + $0x8] sm:$0xff] }
  0x84   :  { %v1622_v52 = vpack.c.bf16 %v178_v51, %v176_v50  ;;  %v522_v57 = vrot.slane %v1626_v55, 1  ;;  %v525_v58 = vrot.slane %v1628_v56, 1 }
  0x85   :  { %868 = vmatpush1.bf16.msra.mxu0 %v1536_v37  ;;  %932 = vmatpush1.bf16.msra.mxu1 %v1536_v37 }
  0x86   :  { %870 = vmatprep.subr.bf16.mxu0 %v1540_v39  ;;  %934 = vmatprep.subr.bf16.mxu1 %v1540_v39 }
  0x89   :  { %872 = vmatpush1.bf16.msra.mxu0 %v1550_v47  ;;  %936 = vmatpush1.bf16.msra.mxu1 %v1550_v47 }
  0x8a   :  { %874 = vmatprep.subr.bf16.mxu0 %v1554_v48  ;;  %938 = vmatprep.subr.bf16.mxu1 %v1554_v48 }
  0x8d   :  { %876 = vmatpush1.bf16.msra.mxu0 %v1558_v53  ;;  %940 = vmatpush1.bf16.msra.mxu1 %v1558_v53 }
  0x8e   :  { %878 = vmatprep.subr.bf16.mxu0 %v1562_v54  ;;  %942 = vmatprep.subr.bf16.mxu1 %v1562_v54 }
  0x91   :  { %880 = vmatpush1.bf16.msra.mxu0 %v1566_v59  ;;  %944 = vmatpush1.bf16.msra.mxu1 %v1566_v59 }
  0x92   :  { %882 = vmatprep.subr.bf16.mxu0 %v1570_v60  ;;  %946 = vmatprep.subr.bf16.mxu1 %v1570_v60 }
  0x95   :  { %884 = vmatpush1.bf16.msra.mxu0 %v1574_v1  ;;  %948 = vmatpush1.bf16.msra.mxu1 %v1574_v1 }
  0x96   :  { %886 = vmatprep.subr.bf16.mxu0 %v1578_v2  ;;  %950 = vmatprep.subr.bf16.mxu1 %v1578_v2 }
  0x99   :  { %888 = vmatpush1.bf16.msra.mxu0 %v1582_v10  ;;  %952 = vmatpush1.bf16.msra.mxu1 %v1582_v10 }
  0x9a   :  { %890 = vmatprep.subr.bf16.mxu0 %v1586_v11  ;;  %954 = vmatprep.subr.bf16.mxu1 %v1586_v11 }
  0x9d   :  { %892 = vmatpush1.bf16.msra.mxu0 %v1590_v18  ;;  %956 = vmatpush1.bf16.msra.mxu1 %v1590_v18 }
  0x9e   :  { %894 = vmatprep.subr.bf16.mxu0 %v1594_v21  ;;  %958 = vmatprep.subr.bf16.mxu1 %v1594_v21 }
  0xa1   :  { %896 = vmatpush1.bf16.msra.mxu0 %v1598_v28  ;;  %960 = vmatpush1.bf16.msra.mxu1 %v1598_v28 }
  0xa2   :  { %898 = vmatprep.subr.bf16.mxu0 %v1602_v29  ;;  %962 = vmatprep.subr.bf16.mxu1 %v1602_v29 }
  0xa5   :  { %900 = vmatpush1.bf16.msra.mxu0 %v1606_v36  ;;  %964 = vmatpush1.bf16.msra.mxu1 %v1606_v36 }
  0xa6   :  { %902 = vmatprep.subr.bf16.mxu0 %v1610_v38  ;;  %966 = vmatprep.subr.bf16.mxu1 %v1610_v38 }
  0xa9   :  { %904 = vmatpush1.bf16.msra.mxu0 %v1614_v46  ;;  %968 = vmatpush1.bf16.msra.mxu1 %v1614_v46 }
  0xaa   :  { %906 = vmatprep.subr.bf16.mxu0 %v1618_v49  ;;  %970 = vmatprep.subr.bf16.mxu1 %v1618_v49 }
  0xad   :  { %908 = vmatpush1.bf16.msra.mxu0 %v1622_v52  ;;  %972 = vmatpush1.bf16.msra.mxu1 %v1622_v52 }
  0xae   :  { %974 = vmatprep.subr.bf16.mxu0 %v1494_v3  ;;  %1038 = vmatprep.subr.bf16.mxu1 %v1494_v3  ;;  %v180_v3 = vsub.f32 %v1542_v41, %v1544_v42 }
  0xb0   :  { %298 = vmatmul.mubr.f32.vlgmr.msra.gmra.mrb[0].mxu0 %v1542_v41  ;;  %369 = vmatmul.mubr.f32.vlgmr.msra.gmra.mrb[0].mxu1 %v1544_v42 }
  0xb1   :  { %976 = vmatpush1.bf16.msra.mxu0 %v1496_v7  ;;  %1040 = vmatpush1.bf16.msra.mxu1 %v1496_v7  ;;  %v181_v7 = vsub.f32 %v1626_v55, %v1628_v56 }
  0xb2   :  { %978 = vmatprep.subr.bf16.mxu0 %v1498_v8  ;;  %1042 = vmatprep.subr.bf16.mxu1 %v1498_v8  ;;  %v112_v8 = vld [vmem:[#allocation8] sm:$0xff] }
  0xb3   :  { %591 = vmatprep.mubr.f32.mxu0 %v522_v57  ;;  %662 = vmatprep.mubr.f32.mxu1 %v525_v58 }
  0xb5   :  { %980 = vmatpush1.bf16.msra.mxu0 %v1504_v13  ;;  %1044 = vmatpush1.bf16.msra.mxu1 %v1504_v13  ;;  %v113_v13 = vld [vmem:[#allocation8 + $0x8] sm:$0xff] }
  0xb6   :  { %982 = vmatprep.subr.bf16.mxu0 %v1508_v14  ;;  %1046 = vmatprep.subr.bf16.mxu1 %v1508_v14  ;;  %v114_v14 = vld [vmem:[#allocation10] sm:$0xff] }
  0xb9   :  { %984 = vmatpush1.bf16.msra.mxu0 %v1512_v19  ;;  %1048 = vmatpush1.bf16.msra.mxu1 %v1512_v19  ;;  %v182_v19 = vmul.f32 %v180_v3, %v180_v3 }
  0xba   :  { %986 = vmatprep.subr.bf16.mxu0 %v1516_v20  ;;  %1050 = vmatprep.subr.bf16.mxu1 %v1516_v20  ;;  %v183_v20 = vmul.f32 %v181_v7, %v181_v7 }
  0xbd   :  { %988 = vmatpush1.bf16.msra.mxu0 %v1520_v25  ;;  %1052 = vmatpush1.bf16.msra.mxu1 %v1520_v25  ;;  %v115_v25 = vld [vmem:[#allocation10 + $0x8] sm:$0xff] }
  0xbe   :  { %990 = vmatprep.subr.bf16.mxu0 %v1524_v26  ;;  %1054 = vmatprep.subr.bf16.mxu1 %v1524_v26  ;;  %v195_v26 = vsub.f32 %v112_v8, %v114_v14 }
  0xc1   :  { %992 = vmatpush1.bf16.msra.mxu0 %v1528_v31  ;;  %1056 = vmatpush1.bf16.msra.mxu1 %v1528_v31  ;;  %v196_v31 = vsub.f32 %v113_v13, %v115_v25 }
  0xc2   :  { %994 = vmatprep.subr.bf16.mxu0 %v1532_v32  ;;  %1058 = vmatprep.subr.bf16.mxu1 %v1532_v32  ;;  %v184_v32 = vadd.f32 %v183_v20, %v182_v19 }
  0xc4   :  { %185 = vadd.xlane.f32.xlu0 %v184_v32 }
  0xc5   :  { %996 = vmatpush1.bf16.msra.mxu0 %v1536_v37  ;;  %1060 = vmatpush1.bf16.msra.mxu1 %v1536_v37  ;;  %v197_v37 = vsub.f32 %v180_v3, %v195_v26 }
  0xc6   :  { %998 = vmatprep.subr.bf16.mxu0 %v1540_v39  ;;  %1062 = vmatprep.subr.bf16.mxu1 %v1540_v39  ;;  %v198_v39 = vsub.f32 %v181_v7, %v196_v31 }
  0xc9   :  { %1000 = vmatpush1.bf16.msra.mxu0 %v1550_v47  ;;  %1064 = vmatpush1.bf16.msra.mxu1 %v1550_v47  ;;  %v199_v47 = vmul.f32 %v197_v37, %v197_v37 }
  0xca   :  { %1002 = vmatprep.subr.bf16.mxu0 %v1554_v48  ;;  %1066 = vmatprep.subr.bf16.mxu1 %v1554_v48  ;;  %v200_v48 = vmul.f32 %v198_v39, %v198_v39 }
  0xcd   :  { %1004 = vmatpush1.bf16.msra.mxu0 %v1558_v53  ;;  %1068 = vmatpush1.bf16.msra.mxu1 %v1558_v53  ;;  %v201_v53 = vadd.f32 %v200_v48, %v199_v47 }
  0xce   :  { %1006 = vmatprep.subr.bf16.mxu0 %v1562_v54  ;;  %1070 = vmatprep.subr.bf16.mxu1 %v1562_v54  ;;  %v418_v54 = vmul.f32 %v1544_v42, %v1544_v42 }
  0xcf   :  { %202 = vadd.xlane.f32.xlu0 %v201_v53 }
  0xd1   :  { %1008 = vmatpush1.bf16.msra.mxu0 %v1566_v59  ;;  %1072 = vmatpush1.bf16.msra.mxu1 %v1566_v59  ;;  %v106_v59 = vld [vmem:[#allocation2] sm:$0xff] }
  0xd2   :  { %1010 = vmatprep.subr.bf16.mxu0 %v1570_v60  ;;  %1074 = vmatprep.subr.bf16.mxu1 %v1570_v60  ;;  %v416_v60 = vsub.f32 %v106_v59, %v1544_v42  ;;  %v417_v62 = vsub.f32 %v106_v59, %v1542_v41 }
  0xd3   :  { %419 = vadd.xlane.f32.xlu0 %v418_v54 }
  0xd4   :  { %v438_v61 = vmul.f32 %v416_v60, %v416_v60  ;;  %v468_v63 = vmul.f32 %v417_v62, %v416_v60 }
  0xd5   :  { %1012 = vmatpush1.bf16.msra.mxu0 %v1574_v1  ;;  %1076 = vmatpush1.bf16.msra.mxu1 %v1574_v1  ;;  %v212_v1 = vlaneseq }
  0xd6   :  { %1014 = vmatprep.subr.bf16.mxu0 %v1578_v2  ;;  %1078 = vmatprep.subr.bf16.mxu1 %v1578_v2 }
  0xd7   :  { %439 = vadd.xlane.f32.xlu0 %v438_v61  ;;  %v1712_v2 = vand.u32 127, %v212_v1  ;;  %v711_v1 = vmul.f32 %v1628_v56, %v1628_v56 }
  0xd9   :  { %1016 = vmatpush1.bf16.msra.mxu0 %v1582_v10  ;;  %1080 = vmatpush1.bf16.msra.mxu1 %v1582_v10  ;;  %v214_v6 = vadd.s32 128, %v1712_v2  ;;  %vm221_vm0 = vcmp.eq.s32.totalorder %v1712_v2, 0  ;;  %vm215_vm3 = vcmp.ge.s32.totalorder %v1712_v2, 1 }
  0xda   :  { %1018 = vmatprep.subr.bf16.mxu0 %v1586_v11  ;;  %1082 = vmatprep.subr.bf16.mxu1 %v1586_v11 }
  0xdb   :  { %459 = vadd.xlane.f32.xlu0 %v458_v0  ;;  %vm224_vm2 = vcmp.eq.s32.totalorder %v214_v6, 128  ;;  %v721_v0 = vmul.f32 %v1626_v55, %v1626_v55 }
  0xdd   :  { %1020 = vmatpush1.bf16.msra.mxu0 %v1590_v18  ;;  %1084 = vmatpush1.bf16.msra.mxu1 %v1590_v18 }
  0xde   :  { %1022 = vmatprep.subr.bf16.mxu0 %v1594_v21  ;;  %1086 = vmatprep.subr.bf16.mxu1 %v1594_v21 }
  0xe1   :  { %1024 = vmatpush1.bf16.msra.mxu0 %v1598_v28  ;;  %1088 = vmatpush1.bf16.msra.mxu1 %v1598_v28 }
  0xe2   :  { %1026 = vmatprep.subr.bf16.mxu0 %v1602_v29  ;;  %1090 = vmatprep.subr.bf16.mxu1 %v1602_v29 }
  0xe5   :  { %1028 = vmatpush1.bf16.msra.mxu0 %v1606_v36  ;;  %1092 = vmatpush1.bf16.msra.mxu1 %v1606_v36 }
  0xe6   :  { %1030 = vmatprep.subr.bf16.mxu0 %v1610_v38  ;;  %1094 = vmatprep.subr.bf16.mxu1 %v1610_v38  ;;  %v448_v38 = vmul.f32 %v417_v62, %v417_v62 }
  0xe9   :  { %1032 = vmatpush1.bf16.msra.mxu0 %v1614_v46  ;;  %1096 = vmatpush1.bf16.msra.mxu1 %v1614_v46 }
  0xea   :  { %1034 = vmatprep.subr.bf16.mxu0 %v1618_v49  ;;  %1098 = vmatprep.subr.bf16.mxu1 %v1618_v49 }
  0xed   :  { %1036 = vmatpush1.bf16.msra.mxu0 %v1622_v52  ;;  %1100 = vmatpush1.bf16.msra.mxu1 %v1622_v52 }
  0xf0   :  { %592 = vmatmul.mubr.f32.vlgmr.msra.gmra.mrb[2].mxu0 %v1626_v55  ;;  %663 = vmatmul.mubr.f32.vlgmr.msra.gmra.mrb[2].mxu1 %v1628_v56 }
 0x151   :  { %v186_v36 = vpop.xlane.xlu0 %185 }
 0x152   :  { %v187_v40 = vrot.slane %v186_v36, 4 }
 0x154   :  { %v188_v43 = vadd.f32 %v187_v40, %v186_v36 }
 0x156   :  { %v189_v44 = vrot.slane %v188_v43, 2 }
 0x158   :  { %v190_v49 = vadd.f32 %v189_v44, %v188_v43 }
 0x15a   :  { %v191_v51 = vrot.slane %v190_v49, 1 }
 0x15c   :  { %v203_v45 = vpop.xlane.xlu0 %202  ;;  %v192_v57 = vadd.f32 %v191_v51, %v190_v49 }
 0x15d   :  { %v204_v46 = vrot.slane %v203_v45, 4 }
 0x15e   :  { %1101 = vpush %v192_v57 }
 0x15f   :  { %v205_v50 = vadd.f32 %v204_v46, %v203_v45 }
 0x161   :  { %v206_v52 = vrot.slane %v205_v50, 2 }
 0x163   :  { %v207_v58 = vadd.f32 %v206_v52, %v205_v50 }
 0x165   :  { %v208_v3 = vrot.slane %v207_v58, 1 }
 0x167   :  { %v209_v7 = vadd.f32 %v208_v3, %v207_v58 }
 0x169   :  { %1103 = vpush %v209_v7 }
 0x183   :  { %v299_v4 = vpop.f32.mrb[0].mxu0  ;;  %v370_v5 = vpop.f32.mrb[0].mxu1 }
 0x184   :  { %v375_v9 = vand.u32 2147483647, %v299_v4  ;;  %v377_v10 = vand.u32 2147483647, %v370_v5  ;;  %v301_v11 = vpop.f32.mrb[1].mxu0  ;;  %v372_v12 = vpop.f32.mrb[1].mxu1 }
 0x185   :  { %v376_v15 = vand.u32 2147483647, %v301_v11  ;;  %v378_v16 = vand.u32 2147483647, %v372_v12  ;;  %v107_v4 = vld [vmem:[#allocation2 + $0x8] sm:$0xff]  ;;  %v420_v12 = vpop.xlane.xlu0 %419 }
 0x186   :  { %v379_v17 = vsub.f32 %v375_v9, %v377_v10  ;;  %v709_v5 = vsub.f32 %v107_v4, %v1628_v56  ;;  %v710_v2 = vsub.f32 %v107_v4, %v1626_v55  ;;  %v751_v9 = vmul.f32 %v1628_v56, %v1626_v55 }
 0x187   :  { %v380_v18 = vsub.f32 %v376_v15, %v378_v16  ;;  %v421_v16 = vrot.slane %v420_v12, 4 }
 0x188   :  { %v398_v21 = vand.u32 2147483647, %v379_v17  ;;  %v731_v6 = vmul.f32 %v709_v5, %v709_v5  ;;  %v741_v10 = vmul.f32 %v710_v2, %v710_v2  ;;  %v761_v11 = vmul.f32 %v710_v2, %v709_v5 }
 0x189   :  { %v399_v42 = vand.u32 2147483647, %v380_v18  ;;  %v381_v22 = vadd.f32 %v380_v18, %v379_v17  ;;  %v440_v15 = vpop.xlane.xlu0 %439 }
 0x18a   :  { %v400_v23 = vsel %vm221_vm0, %v398_v21, 0.0  ;;  %v441_v17 = vrot.slane %v440_v15, 4 }
 0x18b   :  { %v382_v24 = vand.u32 2147483647, %v381_v22  ;;  %v401_v27 = vsel %vm224_vm2, %v399_v42, 0.0  ;;  %v402_v28 = vsel %vm385_vm1, %v400_v23, 0.0  ;;  %v422_v42 = vadd.f32 %v421_v16, %v420_v12 }
 0x18c   :  { %v403_v29 = vsel %vm385_vm1, %v401_v27, 0.0  ;;  %v442_v23 = vadd.f32 %v441_v17, %v440_v15 }
 0x18d   :  { %v383_v30 = vsel %vm215_vm3, %v382_v24, 0.0  ;;  %v404_v33 = vadd.f32 %v403_v29, %v402_v28  ;;  %v460_v18 = vpop.xlane.xlu0 %459  ;;  %v423_v28 = vrot.slane %v422_v42, 2 }
 0x18e   :  { %v386_v34 = vsel %vm385_vm1, %v383_v30, 0.0  ;;  %v461_v24 = vrot.slane %v460_v18, 4  ;;  %v443_v56 = vrot.slane %v442_v23, 2 }
 0x18f   :  { %389 = vadd.xlane.f32.xlu1 %v386_v34  ;;  %s1743_s5 = spop %1101 }
 0x190   :  { %v444_v45 = vadd.f32 %v443_v56, %v442_v23  ;;  %s194_s10 = smul.f32 0.00048828125, %s1743_s5 }
 0x193   :  { %405 = vadd.xlane.f32.xlu1 %v404_v33  ;;  %v462_v33 = vadd.f32 %v461_v24, %v460_v18 }
 0x195   :  { %v463_v46 = vrot.slane %v462_v33, 2 }
 0x197   :  { %429 = vadd.xlane.f32.xlu1 %v428_v35 }
 0x19a   :  { %s1745_s20 = spop %1103 }
 0x19b   :  { %449 = vadd.xlane.f32.xlu1 %v448_v38  ;;  %v424_v38 = vadd.f32 %v423_v28, %v422_v42 }
 0x19d   :  { %v425_v52 = vrot.slane %v424_v38, 1 }
 0x19f   :  { %469 = vadd.xlane.f32.xlu1 %v468_v63 }
 0x1c3   :  { %v593_v41 = vpop.f32.mrb[2].mxu0  ;;  %v664_v8 = vpop.f32.mrb[2].mxu1 }
 0x1c4   :  { %v669_v13 = vand.u32 2147483647, %v593_v41  ;;  %v671_v14 = vand.u32 2147483647, %v664_v8  ;;  %v595_v19 = vpop.f32.mrb[3].mxu0  ;;  %v666_v20 = vpop.f32.mrb[3].mxu1  ;;  %v464_v8 = vadd.f32 %v463_v46, %v462_v33 }
 0x1c5   :  { %v670_v25 = vand.u32 2147483647, %v595_v19  ;;  %v672_v26 = vand.u32 2147483647, %v666_v20  ;;  %v445_v41 = vrot.slane %v444_v45, 1  ;;  %v426_v20 = vadd.f32 %v425_v52, %v424_v38 }
 0x1c6   :  { %v673_v31 = vsub.f32 %v669_v13, %v671_v14 }
 0x1c7   :  { %v674_v32 = vsub.f32 %v670_v25, %v672_v26 }
 0x1c8   :  { %v691_v37 = vand.u32 2147483647, %v673_v31 }
 0x1c9   :  { %v675_v39 = vadd.f32 %v674_v32, %v673_v31  ;;  %v692_v47 = vand.u32 2147483647, %v674_v32 }
 0x1ca   :  { %v693_v48 = vsel %vm221_vm0, %v691_v37, 0.0  ;;  %v446_v37 = vadd.f32 %v445_v41, %v444_v45 }
 0x1cb   :  { %v694_v53 = vsel %vm224_vm2, %v692_v47, 0.0  ;;  %v695_v54 = vsel %vm385_vm1, %v693_v48, 0.0  ;;  %v676_v59 = vand.u32 2147483647, %v675_v39  ;;  %v465_v39 = vrot.slane %v464_v8, 1 }
 0x1cc   :  { %v696_v60 = vsel %vm385_vm1, %v694_v53, 0.0 }
 0x1cd   :  { %v697_v61 = vadd.f32 %v696_v60, %v695_v54  ;;  %v677_v62 = vsel %vm215_vm3, %v676_v59, 0.0  ;;  %v466_v60 = vadd.f32 %v465_v39, %v464_v8 }
 0x1ce   :  { %v679_v63 = vsel %vm385_vm1, %v677_v62, 0.0 }
 0x1cf   :  { %698 = vadd.xlane.f32.xlu1 %v697_v61  ;;  %682 = vadd.xlane.f32.xlu0 %v679_v63 }
 0x1d3   :  { %722 = vadd.xlane.f32.xlu1 %v721_v0  ;;  %712 = vadd.xlane.f32.xlu0 %v711_v1 }
 0x1d7   :  { %732 = vadd.xlane.f32.xlu0 %v731_v6  ;;  %742 = vadd.xlane.f32.xlu1 %v741_v10 }
 0x1db   :  { %752 = vadd.xlane.f32.xlu0 %v751_v9  ;;  %762 = vadd.xlane.f32.xlu1 %v761_v11 }
 0x21c   :  { %v390_v21 = vpop.xlane.xlu1 %389 }
 0x21d   :  { %v391_v22 = vrot.slane %v390_v21, 4 }
 0x21f   :  { %v392_v27 = vadd.f32 %v391_v22, %v390_v21 }
 0x220   :  { %v406_v29 = vpop.xlane.xlu1 %405 }
 0x221   :  { %v393_v30 = vrot.slane %v392_v27, 2  ;;  %v407_v55 = vrot.slane %v406_v29, 4 }
 0x223   :  { %v408_v34 = vadd.f32 %v407_v55, %v406_v29  ;;  %v394_v35 = vadd.f32 %v393_v30, %v392_v27 }
 0x224   :  { %v430_v36 = vpop.xlane.xlu1 %429 }
 0x225   :  { %v409_v40 = vrot.slane %v408_v34, 2  ;;  %v431_v43 = vrot.slane %v430_v36, 4  ;;  %v395_v44 = vrot.slane %v394_v35, 1 }
 0x227   :  { %v432_v49 = vadd.f32 %v431_v43, %v430_v36  ;;  %v396_v50 = vadd.f32 %v395_v44, %v394_v35  ;;  %v410_v51 = vadd.f32 %v409_v40, %v408_v34 }
 0x228   :  { %v450_v57 = vpop.xlane.xlu1 %449 }
 0x229   :  { %v433_v58 = vrot.slane %v432_v49, 2  ;;  %1105 = vpush %v396_v50  ;;  %v411_v3 = vrot.slane %v410_v51, 1  ;;  %v451_v7 = vrot.slane %v450_v57, 4 }
 0x22b   :  { %v412_v13 = vadd.f32 %v411_v3, %v410_v51  ;;  %v434_v14 = vadd.f32 %v433_v58, %v432_v49  ;;  %v452_v19 = vadd.f32 %v451_v7, %v450_v57 }
 0x22c   :  { %v470_v25 = vpop.xlane.xlu1 %469 }
 0x22d   :  { %1107 = vpush %v412_v13  ;;  %v435_v26 = vrot.slane %v434_v14, 1  ;;  %v453_v31 = vrot.slane %v452_v19, 2  ;;  %v471_v32 = vrot.slane %v470_v25, 4 }
 0x22e   :  { %1109 = vpush %v426_v20 }
 0x22f   :  { %v436_v47 = vadd.f32 %v435_v26, %v434_v14  ;;  %v454_v48 = vadd.f32 %v453_v31, %v452_v19  ;;  %v472_v53 = vadd.f32 %v471_v32, %v470_v25 }
 0x231   :  { %1111 = vpush %v436_v47  ;;  %v455_v54 = vrot.slane %v454_v48, 1  ;;  %v473_v59 = vrot.slane %v472_v53, 2 }
 0x232   :  { %1113 = vpush %v446_v37 }
 0x233   :  { %v456_v61 = vadd.f32 %v455_v54, %v454_v48  ;;  %v474_v62 = vadd.f32 %v473_v59, %v472_v53 }
 0x235   :  { %1115 = vpush %v456_v61  ;;  %v475_v63 = vrot.slane %v474_v62, 1 }
 0x236   :  { %1117 = vpush %v466_v60 }
 0x237   :  { %v476_v0 = vadd.f32 %v475_v63, %v474_v62 }
 0x239   :  { %1119 = vpush %v476_v0 }
 0x25a   :  { %s1747_s0 = spop %1105 }
 0x25c   :  { %v683_v42 = vpop.xlane.xlu0 %682  ;;  %v699_v22 = vpop.xlane.xlu1 %698 }
 0x25d   :  { %v684_v29 = vrot.slane %v683_v42, 4  ;;  %v700_v30 = vrot.slane %v699_v22, 4 }
 0x25e   :  { %s1749_s1 = spop %1107 }
 0x25f   :  { %s414_s21 = sadd.f32 %s1749_s1, %s1747_s0  ;;  %s1753_s22 = spop %1109  ;;  %v685_v38 = vadd.f32 %v684_v29, %v683_v42  ;;  %v701_v43 = vadd.f32 %v700_v30, %v699_v22 }
 0x260   :  { %v713_v23 = vpop.xlane.xlu0 %712  ;;  %v723_v24 = vpop.xlane.xlu1 %722 }
 0x261   :  { %v714_v56 = vrot.slane %v713_v23, 4  ;;  %v724_v35 = vrot.slane %v723_v24, 4  ;;  %v686_v52 = vrot.slane %v685_v38, 2  ;;  %v702_v3 = vrot.slane %v701_v43, 2 }
 0x262   :  { %s1112_s23 = spop %1111 }
 0x263   :  { %s479_s25 = smul.f32 %s1112_s23, %s1753_s22  ;;  %s1756_s27 = spop %1113  ;;  %v715_v45 = vadd.f32 %v714_v56, %v713_v23  ;;  %v725_v50 = vadd.f32 %v724_v35, %v723_v24  ;;  %v687_v19 = vadd.f32 %v686_v52, %v685_v38  ;;  %v703_v25 = vadd.f32 %v702_v3, %v701_v43 }
 0x264   :  { %v733_v27 = vpop.xlane.xlu0 %732  ;;  %s510_s2 = sadd.f32 %s1756_s27, %s1753_s22  ;;  %v743_v28 = vpop.xlane.xlu1 %742 }
 0x265   :  { %v480_v1 = vstv %s479_s25  ;;  %v734_v33 = vrot.slane %v733_v27, 4  ;;  %v744_v36 = vrot.slane %v743_v28, 4  ;;  %v716_v41 = vrot.slane %v715_v45, 2 }
 0x266   :  { %1168 = vrsqrt.f32 %v480_v1  ;;  %vm483_vm4 = vcmp.eq.f32.partialorder %v480_v1, inf  ;;  %v486_v6 = vand.u32 2147483648, %v480_v1  ;;  %vm485_vm5 = vcmp.eq.f32.partialorder %v480_v1, 0.0  ;;  %s1116_s28 = spop %1115  ;;  %s511_s26 = sadd.f32 1e-08, %s510_s2 }
 0x267   :  { %s495_s29 = smul.f32 %s1116_s28, %s1756_s27  ;;  %s1759_s30 = spop %1117  ;;  %v735_v46 = vadd.f32 %v734_v33, %v733_v27  ;;  %v745_v51 = vadd.f32 %v744_v36, %v743_v28  ;;  %v726_v13 = vrot.slane %v725_v50, 2  ;;  %v717_v31 = vadd.f32 %v716_v41, %v715_v45 }
 0x268   :  { %v753_v55 = vpop.xlane.xlu0 %752  ;;  %v763_v34 = vpop.xlane.xlu1 %762  ;;  %s478_s3 = ssub.f32 0.0, %s1759_s30  ;;  %v512_v49 = vstv %s511_s26  ;;  %v688_v47 = vrot.slane %v687_v19, 1  ;;  %v704_v53 = vrot.slane %v703_v25, 1  ;;  %s1780_s26 = smul.f32 0.8, %s194_s10 }
 0x269   :  { %v496_v10 = vstv %s495_s29  ;;  %v754_v40 = vrot.slane %v753_v55, 4  ;;  %v764_v44 = vrot.slane %v763_v34, 4  ;;  %v736_v8 = vrot.slane %v735_v46, 2 }
 0x26a   :  { %1170 = vrsqrt.f32 %v496_v10  ;;  %s1761_s7 = spop %1119  ;;  %vm499_vm6 = vcmp.eq.f32.partialorder %v496_v10, inf  ;;  %v502_v16 = vand.u32 2147483648, %v496_v10  ;;  %vm501_vm7 = vcmp.eq.f32.partialorder %v496_v10, 0.0 }
 0x26b   :  { %v755_v58 = vadd.f32 %v754_v40, %v753_v55  ;;  %v765_v7 = vadd.f32 %v764_v44, %v763_v34  ;;  %v746_v14 = vrot.slane %v745_v51, 2  ;;  %v737_v32 = vadd.f32 %v736_v8, %v735_v46  ;;  %s494_s15 = ssub.f32 0.0, %s1761_s7 }
 0x26c   :  { %v727_v37 = vadd.f32 %v726_v13, %v725_v50  ;;  %v718_v59 = vrot.slane %v717_v31, 1 }
 0x26d   :  { %v756_v20 = vrot.slane %v755_v58, 2  ;;  %v766_v26 = vrot.slane %v765_v7, 2  ;;  %v747_v39 = vadd.f32 %v746_v14, %v745_v51  ;;  %v738_v60 = vrot.slane %v737_v32, 1 }
 0x26e   :  { %v728_v62 = vrot.slane %v727_v37, 1 }
 0x26f   :  { %v757_v48 = vadd.f32 %v756_v20, %v755_v58  ;;  %v767_v54 = vadd.f32 %v766_v26, %v765_v7  ;;  %v748_v63 = vrot.slane %v747_v39, 1 }
 0x270   :  { %v1169_v4 = vpop.eup %1168 }
 0x271   :  { %v482_v5 = vmul.f32 %v1169_v4, %v480_v1  ;;  %v758_v4 = vrot.slane %v757_v48, 1 }
 0x273   :  { %v484_v2 = vsel %vm483_vm4, %v480_v1, %v482_v5  ;;  %v689_v1 = vadd.f32 %v688_v47, %v687_v19  ;;  %v705_v5 = vadd.f32 %v704_v53, %v703_v25 }
 0x274   :  { %v487_v9 = vsel %vm485_vm5, %v486_v6, %v484_v2  ;;  %v1171_v12 = vpop.eup %1170  ;;  %v768_v6 = vrot.slane %v767_v54, 1  ;;  %v719_v2 = vadd.f32 %v718_v59, %v717_v31 }
 0x275   :  { %1121 = vpush %v487_v9  ;;  %v498_v15 = vmul.f32 %v1171_v12, %v496_v10  ;;  %v739_v9 = vadd.f32 %v738_v60, %v737_v32  ;;  %v759_v12 = vadd.f32 %v758_v4, %v757_v48 }
 0x277   :  { %v500_v17 = vsel %vm499_vm6, %v496_v10, %v498_v15  ;;  %v729_v10 = vadd.f32 %v728_v62, %v727_v37  ;;  %v769_v15 = vadd.f32 %v768_v6, %v767_v54 }
 0x278   :  { %v503_v21 = vsel %vm501_vm7, %v502_v16, %v500_v17 }
 0x2a6   :  { %s1122_s8 = spop %1121 }
 0x2a7   :  { %s489_s11 = sadd.f32 1e-08, %s1122_s8 }
 0x2a9   :  { %v490_v11 = vstv %s489_s11 }
 0x2aa   :  { %1172 = vrcp.f32 %v490_v11  ;;  %v749_v11 = vadd.f32 %v748_v63, %v747_v39 }
 0x2b4   :  { %v1173_v18 = vpop.eup %1172 }
 0x2b5   :  { %1123 = vpush %v1173_v18 }
 0x2b6   :  { %1125 = vpush %v503_v21 }
 0x2e6   :  { %s1124_s24 = spop %1123 }
 0x2e7   :  { %s1766_s12 = smul.f32 %s1124_s24, %s478_s3  ;;  %s1126_s13 = spop %1125 }
 0x2e8   :  { %s505_s14 = sadd.f32 1e-08, %s1126_s13 }
 0x2ea   :  { %v506_v57 = vstv %s505_s14 }
 0x2eb   :  { %1174 = vrcp.f32 %v506_v57 }
 0x2ec   :  { %1176 = vrcp.f32 %v512_v49 }
 0x2f5   :  { %v1175_v61 = vpop.eup %1174 }
 0x2f6   :  { %v1177_v0 = vpop.eup %1176  ;;  %1127 = vpush %v1175_v61 }
 0x2f7   :  { %1129 = vpush %v1177_v0 }
 0x2f8   :  { %1131 = vpush %v689_v1 }
 0x2f9   :  { %1133 = vpush %v705_v5 }
 0x2fa   :  { %1135 = vpush %v719_v2 }
 0x2fb   :  { %1137 = vpush %v729_v10 }
 0x2fc   :  { %1139 = vpush %v739_v9 }
 0x2fd   :  { %1141 = vpush %v749_v11 }
 0x2fe   :  { %1143 = vpush %v759_v12 }
 0x2ff   :  { %1145 = vpush %v769_v15 }
 0x327   :  { %s1128_s16 = spop %1127 }
 0x328   :  { %s509_s17 = smul.f32 %s1128_s16, %s494_s15  ;;  %s1130_s18 = spop %1129 }
 0x329   :  { %s515_s4 = smul.f32 %s1130_s18, %s1753_s22  ;;  %s1132_s9 = spop %1131 }
 0x32a   :  { %s1134_s19 = spop %1133 }
 0x32b   :  { %s516_s23 = smul.f32 %s515_s4, %s1766_s12  ;;  %s518_s25 = ssub.f32 1.0, %s515_s4 }
 0x32c   :  { %s707_s27 = sadd.f32 %s1134_s19, %s1132_s9  ;;  %s1772_s28 = spop %1135 }
 0x32d   :  { %s519_s29 = smul.f32 %s518_s25, %s509_s17  ;;  %s1138_s30 = spop %1137 }
 0x32e   :  { %s708_s8 = sadd.f32 %s707_s27, %s414_s21  ;;  %s772_s11 = smul.f32 %s1138_s30, %s1772_s28 }
 0x32f   :  { %s1778_s2 = sadd.f32 %s519_s29, %s516_s23  ;;  %s1140_s0 = spop %1139 }
 0x330   :  { %s814_s7 = smul.f32 0.00048828125, %s708_s8  ;;  %v773_v16 = vstv %s772_s11  ;;  %s1142_s1 = spop %1141 }
 0x331   :  { %1178 = vrsqrt.f32 %v773_v16  ;;  %vm776_vm8 = vcmp.eq.f32.partialorder %v773_v16, inf  ;;  %v779_v21 = vand.u32 2147483648, %v773_v16  ;;  %vm778_vm9 = vcmp.eq.f32.partialorder %v773_v16, 0.0  ;;  %s788_s21 = smul.f32 %s1142_s1, %s1140_s0  ;;  %s1144_s3 = spop %1143 }
 0x332   :  { %s1782_s5 = smul.f32 0.2, %s814_s7  ;;  %s1786_s24 = spop %1145 }
 0x333   :  { %v789_v23 = vstv %s788_s21  ;;  %s803_s14 = sadd.f32 %s1140_s0, %s1772_s28  ;;  %s211_s21 = smul.f32 0.00048828125, %s1745_s20 }
 0x334   :  { %s817_s22 = sadd.f32 %s1782_s5, %s1780_s26  ;;  %1180 = vrsqrt.f32 %v789_v23  ;;  %vm792_vm10 = vcmp.eq.f32.partialorder %v789_v23, inf  ;;  %v795_v29 = vand.u32 2147483648, %v789_v23  ;;  %vm794_vm11 = vcmp.eq.f32.partialorder %v789_v23, 0.0 }
 0x335   :  { %s804_s15 = sadd.f32 1e-08, %s803_s14 }
 0x336   :  { %s771_s16 = ssub.f32 0.0, %s1144_s3  ;;  %s820_s0 = smul.f32 0.0016666667, %s817_s22 }
 0x337   :  { %v805_v33 = vstv %s804_s15  ;;  %s787_s19 = ssub.f32 0.0, %s1786_s24  ;;  %s1320_s15 = scalar_lea.hbm %s1814_s6, 16 }
 0x338   :  { %p1321_p6 = scmp.ne.s32.totalorder %s1814_s6, %s1320_s15  ;;  %p1324_p7 = scmp.lt.u32.totalorder %s1320_s15, %s1814_s6 }
 0x33a   :  { %p1326_p8 = pnand %p1324_p7, %p1321_p6 }
 0x33b   :  { %v1179_v17 = vpop.eup %1178 }
 0x33c   :  { %v775_v18 = vmul.f32 %v1179_v17, %v773_v16 }
 0x33e   :  { %v777_v42 = vsel %vm776_vm8, %v773_v16, %v775_v18  ;;  %v1181_v27 = vpop.eup %1180 }
 0x33f   :  { %v780_v22 = vsel %vm778_vm9, %v779_v21, %v777_v42  ;;  %v791_v28 = vmul.f32 %v1181_v27, %v789_v23 }
 0x340   :  { %1147 = vpush %v780_v22 }
 0x341   :  { %v793_v30 = vsel %vm792_vm10, %v789_v23, %v791_v28 }
 0x342   :  { %v796_v56 = vsel %vm794_vm11, %v795_v29, %v793_v30 }
 0x371   :  { %s1148_s12 = spop %1147 }
 0x372   :  { %s782_s13 = sadd.f32 1e-08, %s1148_s12 }
 0x374   :  { %v783_v24 = vstv %s782_s13 }
 0x375   :  { %1182 = vrcp.f32 %v783_v24 }
 0x37f   :  { %v1183_v55 = vpop.eup %1182 }
 0x380   :  { %1149 = vpush %v1183_v55 }
 0x381   :  { %1151 = vpush %v796_v56 }
 0x3b1   :  { %s1150_s17 = spop %1149 }
 0x3b2   :  { %s786_s18 = smul.f32 %s1150_s17, %s771_s16  ;;  %s1152_s4 = spop %1151 }
 0x3b3   :  { %s798_s9 = sadd.f32 1e-08, %s1152_s4 }
 0x3b5   :  { %v799_v34 = vstv %s798_s9 }
 0x3b6   :  { %1184 = vrcp.f32 %v799_v34 }
 0x3b7   :  { %1186 = vrcp.f32 %v805_v33 }
 0x3c0   :  { %v1185_v35 = vpop.eup %1184 }
 0x3c1   :  { %v1187_v36 = vpop.eup %1186  ;;  %1153 = vpush %v1185_v35 }
 0x3c2   :  { %1155 = vpush %v1187_v36 }
 0x3f2   :  { %s1154_s10 = spop %1153 }
 0x3f3   :  { %s1156_s23 = spop %1155  ;;  %s802_s27 = smul.f32 %s1154_s10, %s787_s19 }
 0x3f4   :  { %s808_s25 = smul.f32 %s1156_s23, %s1772_s28 }
 0x3f6   :  { %s809_s29 = smul.f32 %s808_s25, %s786_s18  ;;  %s811_s30 = ssub.f32 1.0, %s808_s25 }
 0x3f8   :  { %s810_s8 = sadd.f32 %s809_s29, %s1778_s2  ;;  %s812_s11 = smul.f32 %s811_s30, %s802_s27 }
 0x3fa   :  { %s813_s7 = sadd.f32 %s812_s11, %s810_s8 }
 0x3fc   :  { %s823_s1 = smul.f32 0.5, %s813_s7 }
 0x3fe   :  { %s824_s3 = sadd.f32 %s823_s1, %s820_s0 }
 0x400   :  { %s825_s12 = sadd.f32 %s824_s3, %s211_s21 }
 0x402   :  { %827 = sst [smem:[#allocation13]] %s825_s12 }
 0x403   :  { %1329 = shalt.err (!%p1326_p8)
}
 0x404   :  { %s1350_s2 = smov [#allocation13]  }
 0x405   :  { %835 = dma.smem_to_hbm %s1350_s2, 16, %s1814_s6, [#allocation4]  }
 0x406   :  { %1338 = dma.done.wait [#allocation4], 16  }
 0x407   :  { %1339 = vsyncadd [#allocation4], 4294967280 }
 0x408   :  { %839 = sfence }
 0x409   :  { %840 = vsyncpa [#allocation3], 1 }
 0x40a   :  { %841 = vsyncpa [#allocation6], 1 }
 0x40b   :  { %842 = vsyncpa [#allocation9], 1 }
 0x40c   :  { %843 = vsyncpa [#allocation12], 1 }
 0x40d   :  { %844 = vsyncpa [#allocation4], 1 }

</bundles_post_ra>
